<compile_context>
chip_gen: v5e
topology: v5e:2x2
jax: 0.10.0
libtpu: 0.0.40
codegen_flags: <defaults>
</compile_context>

<pallas_src>
from functools import partial

import jax
import jax.numpy as jnp
from jax.experimental import pallas as pl
from jax.experimental.pallas import tpu as pltpu


# ---------------------------------------------------------------------------
# Fused forward kernel.  Every operand is a full-array VMEM block (grid=()).
# ---------------------------------------------------------------------------
def _tcn3d_fused_kernel(xp_ref, w1_ref, b1_ref,
                        w2_ref, b2_ref, w3_ref, b3_ref,
                        w4_ref, b4_ref, w5_ref, b5_ref,
                        wfct_ref, bfc_ref, o_ref,
                        *, batch, time_steps, t_kernel, l_out_final):
    # ---- Conv3d(1, C0, kernel=(1, J, Cin)) == per-frame linear, + ReLU ----
    h = jnp.dot(xp_ref[...], w1_ref[...], preferred_element_type=jnp.float32)
    h = jnp.maximum(h + b1_ref[...], 0.0)                   # (B*T, C0)

    # TODO(synk): nn.Dropout(0.3) is treated as eval-mode identity here.

    # ---- 4x valid Conv1d + ReLU, batch folded into M, im2col'd taps --------
    def conv_relu(h_in, w_ref, b_ref):
        m_out = h_in.shape[0] - (t_kernel - 1)
        # One MXU dot with K = t_kernel * C_in instead of t_kernel small dots.
        x_cat = jnp.concatenate(
            [h_in[k:k + m_out, :] for k in range(t_kernel)], axis=1)
        acc = jnp.dot(x_cat, w_ref[...], preferred_element_type=jnp.float32)
        return jnp.maximum(acc + b_ref[...], 0.0)

    h = conv_relu(h, w2_ref, b2_ref)
    h = conv_relu(h, w3_ref, b3_ref)
    h = conv_relu(h, w4_ref, b4_ref)
    h = conv_relu(h, w5_ref, b5_ref)        # (B*T - 4*(t_kernel-1), C4)

    # ---- FC head.  torch's (C4, L5) row-major flatten order is folded into
    # wfct = (classes, L5, C4); per-batch valid frames live at rows
    # [b*T, b*T + L5) of the flat slab.  Tiny multiply+reduce, no reshapes.
    wfct = wfct_ref[...]                                     # (classes, L5, C4)
    h5_all = jnp.stack(
        [h[b * time_steps:b * time_steps + l_out_final, :]
         for b in range(batch)], axis=0)                     # (B, L5, C4)
    prod = h5_all[:, None, :, :] * wfct[None, :, :, :]       # (B, cls, L5, C4)
    logits = jnp.sum(jnp.sum(prod, axis=3), axis=2)          # (B, classes)
    logits = logits + bfc_ref[...]
    o_ref[...] = jnp.maximum(logits, 0.0).astype(o_ref.dtype)


# ---------------------------------------------------------------------------
# One-time parameter preparation (natural layout -> fused-kernel layout).
# ---------------------------------------------------------------------------
def prepare_params(p):
    k1 = p["w1"].shape[0]
    k1p = ((k1 + 127) // 128) * 128          # lane-pad first dense K to 128
    kp = {
        "w1": jnp.pad(p["w1"], ((0, k1p - k1), (0, 0))),
        "b1": p["b1"].reshape(1, -1),
        "bfc": p["bfc"].reshape(1, -1),
    }
    for i in range(2, 6):
        k, ci, co = p[f"w{i}"].shape
        kp[f"w{i}"] = p[f"w{i}"].reshape(k * ci, co)   # tap-major im2col rows
        kp[f"b{i}"] = p[f"b{i}"].reshape(1, -1)
    c4 = p["w5"].shape[2]
    classes = p["wfc"].shape[1]
    l5 = p["wfc"].shape[0] // c4
    # torch flattens (C4, L5) row-major: fold that order into the weight.
    kp["wfcT"] = p["wfc"].reshape(c4, l5, classes).transpose(2, 1, 0)
    return kp


# ---------------------------------------------------------------------------
# Full TCN3D forward pass (single pallas_call).
# ---------------------------------------------------------------------------
def tcn3d_forward(kp, x):
    bsz, cin, t, j = x.shape
    c0 = kp["w1"].shape[1]
    taps = kp["w2"].shape[0] // c0
    classes, l5, _ = kp["wfcT"].shape
    assert l5 == t - 4 * (taps - 1)

    # Input rearrangement into channels-last per-frame features (+ lane pad).
    xp = jnp.transpose(x, (0, 2, 3, 1)).reshape(bsz * t, j * cin)
    k1p = kp["w1"].shape[0]
    if xp.shape[1] < k1p:
        xp = jnp.pad(xp, ((0, 0), (0, k1p - xp.shape[1])))

    kernel = partial(_tcn3d_fused_kernel, batch=bsz, time_steps=t,
                     t_kernel=taps, l_out_final=l5)
    out = pl.pallas_call(
        kernel,
        out_shape=jax.ShapeDtypeStruct((bsz, classes), jnp.float32),
        compiler_params=pltpu.CompilerParams(
            vmem_limit_bytes=32 * 1024 * 1024),
    )(xp, kp["w1"], kp["b1"], kp["w2"], kp["b2"], kp["w3"], kp["b3"],
      kp["w4"], kp["b4"], kp["w5"], kp["b5"], kp["wfcT"], kp["bfc"])
    if out.shape[0] == 1:
        out = jnp.squeeze(out)
    return out


# ---------------------------------------------------------------------------
# Pure-JAX reference (natural params, high-precision dots) for verification.
# ---------------------------------------------------------------------------
def _ref_conv1d_relu(x, w, b):
    P = jax.lax.Precision.HIGHEST
    k_taps = w.shape[0]
    l_out = x.shape[1] - k_taps + 1
    acc = jnp.zeros((x.shape[0], l_out, w.shape[2]), jnp.float32)
    for k in range(k_taps):
        acc = acc + jnp.einsum("blc,cd->bld", x[:, k:k + l_out, :], w[k],
                               precision=P)
    return jnp.maximum(acc + b, 0.0)


def tcn3d_reference(params, x):
    P = jax.lax.Precision.HIGHEST
    bsz, cin, t, j = x.shape
    xp = jnp.transpose(x, (0, 2, 3, 1)).reshape(bsz * t, j * cin)
    h = jnp.maximum(jnp.dot(xp, params["w1"], precision=P) + params["b1"], 0.0)
    h = h.reshape(bsz, t, -1)
    h = _ref_conv1d_relu(h, params["w2"], params["b2"])
    h = _ref_conv1d_relu(h, params["w3"], params["b3"])
    h = _ref_conv1d_relu(h, params["w4"], params["b4"])
    h = _ref_conv1d_relu(h, params["w5"], params["b5"])
    h = jnp.transpose(h, (0, 2, 1)).reshape(bsz, -1)
    out = jnp.maximum(
        jnp.dot(h, params["wfc"], precision=P) + params["bfc"], 0.0)
    if out.shape[0] == 1:
        out = jnp.squeeze(out)
    return out


if __name__ == "__main__":
    key = jax.random.PRNGKey(0)
    # Small shapes consistent with the module (joints fixed at 23 by the model).
    batch, in_channels, time_steps, joints = 2, 3, 16, 23
    t_kernel = 3
    out_channels = [64, 128, 128, 256, 256]
    num_classes = 3

    keys = jax.random.split(key, 16)
    x = jax.random.normal(
        keys[0], (batch, in_channels, time_steps, joints), jnp.float32)

    params = {}
    c0 = out_channels[0]
    fan1 = joints * in_channels
    params["w1"] = (jax.random.normal(keys[1], (fan1, c0), jnp.float32)
                    / jnp.sqrt(float(fan1)))
    params["b1"] = 0.01 * jax.random.normal(keys[2], (c0,), jnp.float32)
    for li, (ci, co) in enumerate(zip(out_channels[:-1], out_channels[1:]),
                                  start=2):
        fan = ci * t_kernel
        params[f"w{li}"] = (jax.random.normal(
            keys[2 * li - 1], (t_kernel, ci, co), jnp.float32)
            / jnp.sqrt(float(fan)))
        params[f"b{li}"] = 0.01 * jax.random.normal(
            keys[2 * li], (co,), jnp.float32)

    output_frames = time_steps - 4 * (t_kernel - 1)
    output_features = output_frames * out_channels[4]
    params["wfc"] = (jax.random.normal(
        keys[11], (output_features, num_classes), jnp.float32)
        / jnp.sqrt(float(output_features)))
    params["bfc"] = 0.01 * jax.random.normal(
        keys[12], (num_classes,), jnp.float32)

    kparams = prepare_params(params)

    fwd = jax.jit(tcn3d_forward)
    out = fwd(kparams, x)
    out = jax.block_until_ready(out)

    ref = tcn3d_reference(params, x)
    assert out.shape == (batch, num_classes), out.shape
    assert out.shape == ref.shape, (out.shape, ref.shape)
    assert bool(jnp.all(jnp.isfinite(out)))
    assert bool(jnp.allclose(out, ref, rtol=5e-2, atol=5e-2)), (
        float(jnp.max(jnp.abs(out - ref))))
    print("KERNEL_OK")
</pallas_src>

<mosaic_0001>
module attributes {stable_mosaic.version = 11 : i64} {
  func.func @_tcn3d_fused_kernel(%arg0: memref<32x128xf32, #tpu.memory_space<vmem>>, %arg1: memref<128x64xf32, #tpu.memory_space<vmem>>, %arg2: memref<1x64xf32, #tpu.memory_space<vmem>>, %arg3: memref<192x128xf32, #tpu.memory_space<vmem>>, %arg4: memref<1x128xf32, #tpu.memory_space<vmem>>, %arg5: memref<384x128xf32, #tpu.memory_space<vmem>>, %arg6: memref<1x128xf32, #tpu.memory_space<vmem>>, %arg7: memref<384x256xf32, #tpu.memory_space<vmem>>, %arg8: memref<1x256xf32, #tpu.memory_space<vmem>>, %arg9: memref<768x256xf32, #tpu.memory_space<vmem>>, %arg10: memref<1x256xf32, #tpu.memory_space<vmem>>, %arg11: memref<3x8x256xf32, #tpu.memory_space<vmem>>, %arg12: memref<1x3xf32, #tpu.memory_space<vmem>>, %arg13: memref<2x3xf32, #tpu.memory_space<vmem>>) attributes {dimension_semantics = [], scalar_prefetch = 0 : i64, scratch_operands = 0 : i64, tpu.core_type = #tpu.core_type<tc>} {
    %c0 = arith.constant 0 : index
    %c0_0 = arith.constant 0 : index
    %0 = vector.load %arg0[%c0, %c0_0] : memref<32x128xf32, #tpu.memory_space<vmem>>, vector<32x128xf32>
    %c0_1 = arith.constant 0 : index
    %c0_2 = arith.constant 0 : index
    %1 = vector.load %arg1[%c0_1, %c0_2] : memref<128x64xf32, #tpu.memory_space<vmem>>, vector<128x64xf32>
    %cst = arith.constant dense<0.000000e+00> : vector<32x64xf32>
    %2 = tpu.matmul %0, %1, %cst {dimension_numbers = #tpu.dot_dimension_numbers<[1], [0], [0], [1], [0, 0, 1, 1], [], []>} : vector<32x128xf32>, vector<128x64xf32>, vector<32x64xf32> -> vector<32x64xf32>
    %c0_3 = arith.constant 0 : index
    %c0_4 = arith.constant 0 : index
    %3 = vector.load %arg2[%c0_3, %c0_4] : memref<1x64xf32, #tpu.memory_space<vmem>>, vector<1x64xf32>
    %4 = vector.broadcast %3 : vector<1x64xf32> to vector<32x64xf32>
    %5 = arith.addf %2, %4 : vector<32x64xf32>
    %cst_5 = arith.constant 0.000000e+00 : f32
    %6 = vector.broadcast %cst_5 : f32 to vector<32x64xf32>
    %7 = arith.maximumf %5, %6 : vector<32x64xf32>
    %8 = vector.extract_strided_slice %7 {offsets = [0, 0], sizes = [30, 64], strides = [1, 1]} : vector<32x64xf32> to vector<30x64xf32>
    %9 = vector.extract_strided_slice %7 {offsets = [1, 0], sizes = [30, 64], strides = [1, 1]} : vector<32x64xf32> to vector<30x64xf32>
    %10 = vector.extract_strided_slice %7 {offsets = [2, 0], sizes = [30, 64], strides = [1, 1]} : vector<32x64xf32> to vector<30x64xf32>
    %11 = tpu.concatenate %8, %9, %10 in 1 : vector<30x64xf32>, vector<30x64xf32>, vector<30x64xf32> -> vector<30x192xf32>
    %c0_6 = arith.constant 0 : index
    %c0_7 = arith.constant 0 : index
    %12 = vector.load %arg3[%c0_6, %c0_7] : memref<192x128xf32, #tpu.memory_space<vmem>>, vector<192x128xf32>
    %cst_8 = arith.constant dense<0.000000e+00> : vector<30x128xf32>
    %13 = tpu.matmul %11, %12, %cst_8 {dimension_numbers = #tpu.dot_dimension_numbers<[1], [0], [0], [1], [0, 0, 1, 1], [], []>} : vector<30x192xf32>, vector<192x128xf32>, vector<30x128xf32> -> vector<30x128xf32>
    %c0_9 = arith.constant 0 : index
    %c0_10 = arith.constant 0 : index
    %14 = vector.load %arg4[%c0_9, %c0_10] : memref<1x128xf32, #tpu.memory_space<vmem>>, vector<1x128xf32>
    %15 = vector.broadcast %14 : vector<1x128xf32> to vector<30x128xf32>
    %16 = arith.addf %13, %15 : vector<30x128xf32>
    %cst_11 = arith.constant 0.000000e+00 : f32
    %17 = vector.broadcast %cst_11 : f32 to vector<30x128xf32>
    %18 = arith.maximumf %16, %17 : vector<30x128xf32>
    %19 = vector.extract_strided_slice %18 {offsets = [0, 0], sizes = [28, 128], strides = [1, 1]} : vector<30x128xf32> to vector<28x128xf32>
    %20 = vector.extract_strided_slice %18 {offsets = [1, 0], sizes = [28, 128], strides = [1, 1]} : vector<30x128xf32> to vector<28x128xf32>
    %21 = vector.extract_strided_slice %18 {offsets = [2, 0], sizes = [28, 128], strides = [1, 1]} : vector<30x128xf32> to vector<28x128xf32>
    %22 = tpu.concatenate %19, %20, %21 in 1 : vector<28x128xf32>, vector<28x128xf32>, vector<28x128xf32> -> vector<28x384xf32>
    %c0_12 = arith.constant 0 : index
    %c0_13 = arith.constant 0 : index
    %23 = vector.load %arg5[%c0_12, %c0_13] : memref<384x128xf32, #tpu.memory_space<vmem>>, vector<384x128xf32>
    %cst_14 = arith.constant dense<0.000000e+00> : vector<28x128xf32>
    %24 = tpu.matmul %22, %23, %cst_14 {dimension_numbers = #tpu.dot_dimension_numbers<[1], [0], [0], [1], [0, 0, 1, 1], [], []>} : vector<28x384xf32>, vector<384x128xf32>, vector<28x128xf32> -> vector<28x128xf32>
    %c0_15 = arith.constant 0 : index
    %c0_16 = arith.constant 0 : index
    %25 = vector.load %arg6[%c0_15, %c0_16] : memref<1x128xf32, #tpu.memory_space<vmem>>, vector<1x128xf32>
    %26 = vector.broadcast %25 : vector<1x128xf32> to vector<28x128xf32>
    %27 = arith.addf %24, %26 : vector<28x128xf32>
    %cst_17 = arith.constant 0.000000e+00 : f32
    %28 = vector.broadcast %cst_17 : f32 to vector<28x128xf32>
    %29 = arith.maximumf %27, %28 : vector<28x128xf32>
    %30 = vector.extract_strided_slice %29 {offsets = [0, 0], sizes = [26, 128], strides = [1, 1]} : vector<28x128xf32> to vector<26x128xf32>
    %31 = vector.extract_strided_slice %29 {offsets = [1, 0], sizes = [26, 128], strides = [1, 1]} : vector<28x128xf32> to vector<26x128xf32>
    %32 = vector.extract_strided_slice %29 {offsets = [2, 0], sizes = [26, 128], strides = [1, 1]} : vector<28x128xf32> to vector<26x128xf32>
    %33 = tpu.concatenate %30, %31, %32 in 1 : vector<26x128xf32>, vector<26x128xf32>, vector<26x128xf32> -> vector<26x384xf32>
    %c0_18 = arith.constant 0 : index
    %c0_19 = arith.constant 0 : index
    %34 = vector.load %arg7[%c0_18, %c0_19] : memref<384x256xf32, #tpu.memory_space<vmem>>, vector<384x256xf32>
    %cst_20 = arith.constant dense<0.000000e+00> : vector<26x256xf32>
    %35 = tpu.matmul %33, %34, %cst_20 {dimension_numbers = #tpu.dot_dimension_numbers<[1], [0], [0], [1], [0, 0, 1, 1], [], []>} : vector<26x384xf32>, vector<384x256xf32>, vector<26x256xf32> -> vector<26x256xf32>
    %c0_21 = arith.constant 0 : index
    %c0_22 = arith.constant 0 : index
    %36 = vector.load %arg8[%c0_21, %c0_22] : memref<1x256xf32, #tpu.memory_space<vmem>>, vector<1x256xf32>
    %37 = vector.broadcast %36 : vector<1x256xf32> to vector<26x256xf32>
    %38 = arith.addf %35, %37 : vector<26x256xf32>
    %cst_23 = arith.constant 0.000000e+00 : f32
    %39 = vector.broadcast %cst_23 : f32 to vector<26x256xf32>
    %40 = arith.maximumf %38, %39 : vector<26x256xf32>
    %41 = vector.extract_strided_slice %40 {offsets = [0, 0], sizes = [24, 256], strides = [1, 1]} : vector<26x256xf32> to vector<24x256xf32>
    %42 = vector.extract_strided_slice %40 {offsets = [1, 0], sizes = [24, 256], strides = [1, 1]} : vector<26x256xf32> to vector<24x256xf32>
    %43 = vector.extract_strided_slice %40 {offsets = [2, 0], sizes = [24, 256], strides = [1, 1]} : vector<26x256xf32> to vector<24x256xf32>
    %44 = tpu.concatenate %41, %42, %43 in 1 : vector<24x256xf32>, vector<24x256xf32>, vector<24x256xf32> -> vector<24x768xf32>
    %c0_24 = arith.constant 0 : index
    %c0_25 = arith.constant 0 : index
    %45 = vector.load %arg9[%c0_24, %c0_25] : memref<768x256xf32, #tpu.memory_space<vmem>>, vector<768x256xf32>
    %cst_26 = arith.constant dense<0.000000e+00> : vector<24x256xf32>
    %46 = tpu.matmul %44, %45, %cst_26 {dimension_numbers = #tpu.dot_dimension_numbers<[1], [0], [0], [1], [0, 0, 1, 1], [], []>} : vector<24x768xf32>, vector<768x256xf32>, vector<24x256xf32> -> vector<24x256xf32>
    %c0_27 = arith.constant 0 : index
    %c0_28 = arith.constant 0 : index
    %47 = vector.load %arg10[%c0_27, %c0_28] : memref<1x256xf32, #tpu.memory_space<vmem>>, vector<1x256xf32>
    %48 = vector.broadcast %47 : vector<1x256xf32> to vector<24x256xf32>
    %49 = arith.addf %46, %48 : vector<24x256xf32>
    %cst_29 = arith.constant 0.000000e+00 : f32
    %50 = vector.broadcast %cst_29 : f32 to vector<24x256xf32>
    %51 = arith.maximumf %49, %50 : vector<24x256xf32>
    %c0_30 = arith.constant 0 : index
    %c0_31 = arith.constant 0 : index
    %c0_32 = arith.constant 0 : index
    %52 = vector.load %arg11[%c0_30, %c0_31, %c0_32] : memref<3x8x256xf32, #tpu.memory_space<vmem>>, vector<3x8x256xf32>
    %53 = vector.extract_strided_slice %51 {offsets = [0, 0], sizes = [8, 256], strides = [1, 1]} : vector<24x256xf32> to vector<8x256xf32>
    %54 = vector.extract_strided_slice %51 {offsets = [16, 0], sizes = [8, 256], strides = [1, 1]} : vector<24x256xf32> to vector<8x256xf32>
    %55 = vector.shape_cast %53 : vector<8x256xf32> to vector<1x8x256xf32>
    %56 = vector.shape_cast %54 : vector<8x256xf32> to vector<1x8x256xf32>
    %57 = tpu.concatenate %55, %56 in 0 : vector<1x8x256xf32>, vector<1x8x256xf32> -> vector<2x8x256xf32>
    %58 = vector.shape_cast %57 : vector<2x8x256xf32> to vector<2x1x8x256xf32>
    %59 = vector.shape_cast %52 : vector<3x8x256xf32> to vector<1x3x8x256xf32>
    %60 = vector.broadcast %58 : vector<2x1x8x256xf32> to vector<2x3x8x256xf32>
    %61 = vector.broadcast %59 : vector<1x3x8x256xf32> to vector<2x3x8x256xf32>
    %62 = arith.mulf %60, %61 : vector<2x3x8x256xf32>
    %cst_33 = arith.constant dense<0.000000e+00> : vector<2x3x8xf32>
    %63 = vector.multi_reduction <add>, %62, %cst_33 [3] : vector<2x3x8x256xf32> to vector<2x3x8xf32>
    %cst_34 = arith.constant dense<0.000000e+00> : vector<2x3xf32>
    %64 = vector.multi_reduction <add>, %63, %cst_34 [2] : vector<2x3x8xf32> to vector<2x3xf32>
    %c0_35 = arith.constant 0 : index
    %c0_36 = arith.constant 0 : index
    %65 = vector.load %arg12[%c0_35, %c0_36] : memref<1x3xf32, #tpu.memory_space<vmem>>, vector<1x3xf32>
    %66 = vector.broadcast %65 : vector<1x3xf32> to vector<2x3xf32>
    %67 = arith.addf %64, %66 : vector<2x3xf32>
    %cst_37 = arith.constant 0.000000e+00 : f32
    %68 = vector.broadcast %cst_37 : f32 to vector<2x3xf32>
    %69 = arith.maximumf %67, %68 : vector<2x3xf32>
    %c0_38 = arith.constant 0 : index
    %c0_39 = arith.constant 0 : index
    %70 = vector.load %arg13[%c0_38, %c0_39] : memref<2x3xf32, #tpu.memory_space<vmem>>, vector<2x3xf32>
    tpu.vector_store %arg13[%c0_38, %c0_39], %69 {strides = array<i32>} : memref<2x3xf32, #tpu.memory_space<vmem>>, vector<2x3xf32>,
    return
  }
}

</mosaic_0001>

<bundles_post_ra>
// kernel: tcn3d_forward.1
= control target key start
LH: loop header
LB: loop body
LE: loop exit
PB: predicated region body
PF: predicated region fallthrough
CT: control target
= control target key end

     0   :  { %18 = vsyncpa [#allocation3], 0  ;;  %s2061_s0 = inlined_call_operand.vmem [shape: f32[32,128], index: 0, kind: input, shape index: {}]   ;;  %s2062_s1 = inlined_call_operand.vmem [shape: f32[128,64], index: 1, kind: input, shape index: {}]   ;;  %s2063_s2 = inlined_call_operand.vmem [shape: f32[1,64], index: 2, kind: input, shape index: {}]   ;;  %s2064_s3 = inlined_call_operand.vmem [shape: f32[192,128], index: 3, kind: input, shape index: {}]   ;;  %s2065_s4 = inlined_call_operand.vmem [shape: f32[1,128], index: 4, kind: input, shape index: {}]   ;;  %s2066_s5 = inlined_call_operand.vmem [shape: f32[384,128], index: 5, kind: input, shape index: {}]   ;;  %s2067_s6 = inlined_call_operand.vmem [shape: f32[1,128], index: 6, kind: input, shape index: {}]   ;;  %s2068_s7 = inlined_call_operand.hbm [shape: f32[384,256], index: 7, kind: input, shape index: {}]   ;;  %s2069_s8 = inlined_call_operand.vmem [shape: f32[1,256], index: 8, kind: input, shape index: {}]   ;;  %s2070_s9 = inlined_call_operand.hbm [shape: f32[768,256], index: 9, kind: input, shape index: {}]   ;;  %s2071_s10 = inlined_call_operand.vmem [shape: f32[1,256], index: 10, kind: input, shape index: {}]   ;;  %s2072_s11 = inlined_call_operand.vmem [shape: f32[3,8,256], index: 11, kind: input, shape index: {}]   ;;  %s2073_s12 = inlined_call_operand.vmem [shape: f32[1,3], index: 12, kind: input, shape index: {}]   ;;  %s2074_s13 = inlined_call_operand.hbm [shape: f32[2,3], index: 13, kind: output, shape index: {}]  }
   0x1   :  { %19 = vsyncpa [#allocation6], 0 }
   0x2   :  { %20 = vsyncpa [#allocation4], 0  ;;  %s39_s27 = sshll.u32 %s2068_s7, 4  ;;  %s1505_s28 = smov [#allocation2]   ;;  %s40_s27 = int_to_ptr.hbm [resolvable:$true] %s39_s27 }
   0x3   :  { %s41_s29 = sshll.u32 %s1505_s28, 4  ;;  %s54_s15 = sshll.u32 %s2070_s9, 4  ;;  %s42_s29 = int_to_ptr.vmem [resolvable:$true] %s41_s29  ;;  %s55_s15 = int_to_ptr.hbm [resolvable:$true] %s54_s15 }
   0x4   :  { %s1506_s16 = smov 256   ;;  %s1507_s17 = smov 16  }
   0x5   :  { %47 = dma.hbm_to_vmem [thread:$0]  %s40_s27, 12288, %s42_s29, [#allocation3], %s1506_s16, %s1506_s16, %s1507_s17  }
   0x6   :  { %s1508_s18 = smov [#allocation5]  }
   0x7   :  { %s56_s19 = sshll.u32 %s1508_s18, 4  ;;  %s57_s19 = int_to_ptr.vmem [resolvable:$true] %s56_s19 }
   0x8   :  { %62 = dma.hbm_to_vmem [thread:$0]  %s55_s15, 24576, %s57_s19, [#allocation6], %s1506_s16, %s1506_s16, %s1507_s17  }
   0x9   :  { %1499 = dma.done.wait [#allocation3], 12288  }
   0xa   :  { %1500 = vsyncadd [#allocation3], 4294955008 }
   0xb   :  { %1501 = dma.done.wait [#allocation6], 24576  }
   0xc   :  { %1502 = vsyncadd [#allocation6], 4294942720  ;;  %v96_v0 = vld [vmem:[%s2062_s1 + $0x78] sm:$0xff]  ;;  %v95_v1 = vld [vmem:[%s2062_s1 + $0x70] sm:$0xff]  ;;  %vm158_vm0 = vcmask 1045504   ;;  %vm166_vm1 = vcmask 523264  }
   0xd   :  { %101 = vmatpush.msra.mxu0 %v96_v0  ;;  %v94_v2 = vld [vmem:[%s2062_s1 + $0x68] sm:$0xff]  ;;  %v93_v3 = vld [vmem:[%s2062_s1 + $0x60] sm:$0xff]  ;;  %v92_v4 = vld [vmem:[%s2062_s1 + $0x58] sm:$0xff]  ;;  %vm138_vm2 = vcmask 1046528   ;;  %s1509_s25 = smov 64   ;;  %vm1348_vm3 = vcmask 1041409  }
   0xe   :  { %v91_v5 = vld [vmem:[%s2062_s1 + $0x50] sm:$0xff]  ;;  %v90_v6 = vld [vmem:[%s2062_s1 + $0x48] sm:$0xff]  ;;  %v89_v7 = vld [vmem:[%s2062_s1 + $0x40] sm:$0xff]  ;;  %vm1350_vm4 = vcmask 1042434   ;;  %vm1356_vm5 = vcmask 59392   ;;  %s1511_s23 = smov [#allocation7]  }
   0xf   :  { %102 = vmatpush.msra.mxu0 %v95_v1  ;;  %v88_v8 = vld [vmem:[%s2062_s1 + $0x38] sm:$0xff]  ;;  %v87_v9 = vld [vmem:[%s2062_s1 + $0x30] sm:$0xff]  ;;  %v86_v10 = vld [vmem:[%s2062_s1 + $0x28] sm:$0xff]  ;;  %s1396_s24 = sshll.u32 %s1511_s23, 4  ;;  %s1398_s27 = sshll.u32 %s2074_s13, 4  ;;  %vm1389_vm6 = vcmask 17408   ;;  %s1397_s24 = int_to_ptr.vmem [resolvable:$true] %s1396_s24  ;;  %s1399_s27 = int_to_ptr.hbm [resolvable:$true] %s1398_s27 }
  0x10   :  { %v85_v11 = vld [vmem:[%s2062_s1 + $0x20] sm:$0xff]  ;;  %v84_v12 = vld [vmem:[%s2062_s1 + $0x18] sm:$0xff]  ;;  %v83_v13 = vld [vmem:[%s2062_s1 + $0x10] sm:$0xff] }
  0x11   :  { %103 = vmatpush.msra.mxu0 %v94_v2  ;;  %v82_v14 = vld [vmem:[%s2062_s1 + $0x8] sm:$0xff]  ;;  %v81_v15 = vld [vmem:[%s2062_s1] sm:$0xff]  ;;  %v79_v18 = vld [vmem:[%s2061_s0 + $0x10] sm:$0xff] }
  0x12   :  { %v77_v16 = vld [vmem:[%s2061_s0] sm:$0xff]  ;;  %v78_v17 = vld [vmem:[%s2061_s0 + $0x8] sm:$0xff]  ;;  %v80_v19 = vld [vmem:[%s2061_s0 + $0x18] sm:$0xff] }
  0x13   :  { %104 = vmatpush.msra.mxu0 %v93_v3  ;;  %v194_v20 = vld [vmem:[%s2064_s3 + $0xb8] sm:$0xff]  ;;  %v193_v21 = vld [vmem:[%s2064_s3 + $0xb0] sm:$0xff]  ;;  %v192_v22 = vld [vmem:[%s2064_s3 + $0xa8] sm:$0xff] }
  0x14   :  { %244 = vmatpush.msra.mxu2 %v194_v20  ;;  %v191_v23 = vld [vmem:[%s2064_s3 + $0xa0] sm:$0xff]  ;;  %v190_v24 = vld [vmem:[%s2064_s3 + $0x98] sm:$0xff]  ;;  %v189_v25 = vld [vmem:[%s2064_s3 + $0x90] sm:$0xff] }
  0x15   :  { %105 = vmatpush.msra.mxu0 %v92_v4  ;;  %v188_v26 = vld [vmem:[%s2064_s3 + $0x88] sm:$0xff]  ;;  %v187_v27 = vld [vmem:[%s2064_s3 + $0x80] sm:$0xff]  ;;  %v186_v32 = vld [vmem:[%s2064_s3 + $0x78] sm:$0xff] }
  0x16   :  { %245 = vmatpush.msra.mxu2 %v193_v21  ;;  %v1423_v29 = vld [vmem:[%s2063_s2] ss:$0 sm:$0xff]  ;;  %v185_v33 = vld [vmem:[%s2064_s3 + $0x70] sm:$0xff]  ;;  %207 = vmatpush.msra.mxu1 %v186_v32  ;;  %v184_v36 = vld [vmem:[%s2064_s3 + $0x68] sm:$0xff] }
  0x17   :  { %106 = vmatpush.msra.mxu0 %v91_v5  ;;  %v183_v38 = vld [vmem:[%s2064_s3 + $0x60] sm:$0xff]  ;;  %v182_v43 = vld [vmem:[%s2064_s3 + $0x58] sm:$0xff]  ;;  %v181_v47 = vld [vmem:[%s2064_s3 + $0x50] sm:$0xff] }
  0x18   :  { %246 = vmatpush.msra.mxu2 %v192_v22  ;;  %208 = vmatpush.msra.mxu1 %v185_v33  ;;  %v180_v49 = vld [vmem:[%s2064_s3 + $0x48] sm:$0xff]  ;;  %v179_v51 = vld [vmem:[%s2064_s3 + $0x40] sm:$0xff]  ;;  %v178_v54 = vld [vmem:[%s2064_s3 + $0x38] sm:$0xff] }
  0x19   :  { %107 = vmatpush.msra.mxu0 %v90_v6  ;;  %v177_v58 = vld [vmem:[%s2064_s3 + $0x30] sm:$0xff]  ;;  %v176_v60 = vld [vmem:[%s2064_s3 + $0x28] sm:$0xff]  ;;  %v175_v62 = vld [vmem:[%s2064_s3 + $0x20] sm:$0xff] }
  0x1a   :  { %247 = vmatpush.msra.mxu2 %v191_v23  ;;  %209 = vmatpush.msra.mxu1 %v184_v36  ;;  %v174_v1 = vld [vmem:[%s2064_s3 + $0x18] sm:$0xff]  ;;  %v173_v4 = vld [vmem:[%s2064_s3 + $0x10] sm:$0xff]  ;;  %v172_v5 = vld [vmem:[%s2064_s3 + $0x8] sm:$0xff] }
  0x1b   :  { %108 = vmatpush.msra.mxu0 %v89_v7  ;;  %v171_v6 = vld [vmem:[%s2064_s3] sm:$0xff]  ;;  %v340_v20 = vld [vmem:[%s2066_s5 + $0x168] sm:$0xff]  ;;  %v306_v21 = vld [vmem:[%s2066_s5 + $0x58] sm:$0xff] }
  0x1c   :  { %248 = vmatpush.msra.mxu2 %v190_v24  ;;  %210 = vmatpush.msra.mxu1 %v183_v38  ;;  %v323_v23 = vld [vmem:[%s2066_s5 + $0xe0] sm:$0xff]  ;;  %v320_v33 = vld [vmem:[%s2066_s5 + $0xc8] sm:$0xff]  ;;  %v301_v38 = vld [vmem:[%s2066_s5 + $0x30] sm:$0xff] }
  0x1d   :  { %109 = vmatpush.msra.mxu0 %v88_v8  ;;  %v339_v24 = vld [vmem:[%s2066_s5 + $0x160] sm:$0xff] }
  0x1e   :  { %249 = vmatpush.msra.mxu2 %v189_v25  ;;  %211 = vmatpush.msra.mxu1 %v182_v43  ;;  %v303_v32 = vld [vmem:[%s2066_s5 + $0x40] sm:$0xff] }
  0x1f   :  { %110 = vmatpush.msra.mxu0 %v87_v9  ;;  %v335_v43 = vld [vmem:[%s2066_s5 + $0x140] sm:$0xff] }
  0x20   :  { %250 = vmatpush.msra.mxu2 %v188_v26  ;;  %212 = vmatpush.msra.mxu1 %v181_v47  ;;  %v305_v26 = vld [vmem:[%s2066_s5 + $0x50] sm:$0xff]  ;;  %v296_v47 = vld [vmem:[%s2066_s5 + $0x8] sm:$0xff] }
  0x21   :  { %111 = vmatpush.msra.mxu0 %v86_v10 }
  0x22   :  { %251 = vmatpush.msra.mxu2 %v187_v27  ;;  %213 = vmatpush.msra.mxu1 %v180_v49  ;;  %v322_v27 = vld [vmem:[%s2066_s5 + $0xd8] sm:$0xff]  ;;  %v333_v49 = vld [vmem:[%s2066_s5 + $0x130] sm:$0xff] }
  0x23   :  { %112 = vmatpush.msra.mxu0 %v85_v11  ;;  %v310_v11 = vld [vmem:[%s2066_s5 + $0x78] sm:$0xff] }
  0x24   :  { %214 = vmatpush.msra.mxu1 %v179_v51  ;;  %347 = vmatpush.msra.mxu3 %v310_v11  ;;  %v316_v51 = vld [vmem:[%s2066_s5 + $0xa8] sm:$0xff] }
  0x25   :  { %113 = vmatpush.msra.mxu0 %v84_v12  ;;  %v309_v12 = vld [vmem:[%s2066_s5 + $0x70] sm:$0xff] }
  0x26   :  { %215 = vmatpush.msra.mxu1 %v178_v54  ;;  %348 = vmatpush.msra.mxu3 %v309_v12  ;;  %v331_v54 = vld [vmem:[%s2066_s5 + $0x120] sm:$0xff]  ;;  %v493_v12 = vld [vmem:[#allocation2 + $0xe8] sm:$0xff] }
  0x27   :  { %114 = vmatpush.msra.mxu0 %v83_v13  ;;  %v308_v13 = vld [vmem:[%s2066_s5 + $0x68] sm:$0xff] }
  0x28   :  { %216 = vmatpush.msra.mxu1 %v177_v58  ;;  %349 = vmatpush.msra.mxu3 %v308_v13  ;;  %v329_v58 = vld [vmem:[%s2066_s5 + $0x110] sm:$0xff] }
  0x29   :  { %115 = vmatpush.msra.mxu0 %v82_v14  ;;  %v326_v14 = vld [vmem:[%s2066_s5 + $0xf8] sm:$0xff]  ;;  %v490_v13 = vld [vmem:[#allocation2 + $0xd0] sm:$0xff] }
  0x2a   :  { %217 = vmatpush.msra.mxu1 %v176_v60  ;;  %376 = vmatpush.msrb.mxu2 %v326_v14  ;;  %v328_v60 = vld [vmem:[%s2066_s5 + $0x108] sm:$0xff] }
  0x2b   :  { %116 = vmatpush.msra.mxu0 %v81_v15  ;;  %v342_v15 = vld [vmem:[%s2066_s5 + $0x178] sm:$0xff] }
  0x2c   :  { %117 = vmatmul.f32.vlgmr.msra.gmra.mxu0 %v77_v16  ;;  %218 = vmatpush.msra.mxu1 %v175_v62  ;;  %v325_v16 = vld [vmem:[%s2066_s5 + $0xf0] sm:$0xff]  ;;  %v327_v62 = vld [vmem:[%s2066_s5 + $0x100] sm:$0xff] }
  0x2d   :  { %405 = vmatpush.msrb.mxu0 %v342_v15  ;;  %377 = vmatpush.msrb.mxu2 %v325_v16  ;;  %v491_v15 = vld [vmem:[#allocation2 + $0xd8] sm:$0xff]  ;;  %v526_v16 = vld [vmem:[#allocation2 + $0x1f0] sm:$0xff] }
  0x2e   :  { %219 = vmatpush.msra.mxu1 %v174_v1 }
  0x30   :  { %220 = vmatpush.msra.mxu1 %v173_v4 }
  0x32   :  { %221 = vmatpush.msra.mxu1 %v172_v5 }
  0x34   :  { %120 = vmatmul.f32.gmra.mxu0 %v78_v17  ;;  %222 = vmatpush.msra.mxu1 %v171_v6  ;;  %v341_v17 = vld [vmem:[%s2066_s5 + $0x170] sm:$0xff] }
  0x35   :  { %406 = vmatpush.msrb.mxu0 %v341_v17  ;;  %v488_v17 = vld [vmem:[#allocation2 + $0xc0] sm:$0xff] }
  0x37   :  { %407 = vmatpush.msrb.mxu0 %v340_v20 }
  0x39   :  { %408 = vmatpush.msrb.mxu0 %v339_v24 }
  0x3c   :  { %123 = vmatmul.f32.gmra.mxu0 %v79_v18  ;;  %v307_v18 = vld [vmem:[%s2066_s5 + $0x60] sm:$0xff] }
  0x3d   :  { %350 = vmatpush.msra.mxu3 %v307_v18  ;;  %v558_v18 = vld [vmem:[#allocation2 + $0x2f0] sm:$0xff] }
  0x3f   :  { %351 = vmatpush.msra.mxu3 %v306_v21 }
  0x41   :  { %352 = vmatpush.msra.mxu3 %v305_v26  ;;  %v489_v26 = vld [vmem:[#allocation2 + $0xc8] sm:$0xff] }
  0x44   :  { %126 = vmatmul.f32.gmra.mxu0 %v80_v19  ;;  %v324_v19 = vld [vmem:[%s2066_s5 + $0xe8] sm:$0xff] }
  0x45   :  { %378 = vmatpush.msrb.mxu2 %v324_v19 }
  0x47   :  { %379 = vmatpush.msrb.mxu2 %v323_v23  ;;  %v524_v23 = vld [vmem:[#allocation2 + $0x1e0] sm:$0xff] }
  0x49   :  { %380 = vmatpush.msrb.mxu2 %v322_v27  ;;  %v486_v27 = vld [vmem:[#allocation2 + $0xb0] sm:$0xff] }
  0xa9   :  { %v118_v28 = vpop.f32.mrf.mxu0 }
  0xaa   :  { %v119_v30 = vadd.f32 %v1423_v29, %v118_v28  ;;  %v338_v28 = vld [vmem:[%s2066_s5 + $0x158] sm:$0xff] }
  0xab   :  { %409 = vmatpush.msrb.mxu0 %v338_v28 }
  0xac   :  { %v1681_v34 = vmax.f32 %v119_v30, 0.0  ;;  %v321_v30 = vld [vmem:[%s2066_s5 + $0xd0] sm:$0xff] }
  0xad   :  { %381 = vmatpush.msrb.mxu2 %v321_v30 }
  0xae   :  { %v159_v39 = vrot.slane %v1681_v34, 2  ;;  %v139_v41 = vrot.slane %v1681_v34, 1 }
  0xaf   :  { %382 = vmatpush.msrb.mxu2 %v320_v33 }
  0xb1   :  { %v121_v31 = vpop.f32.mrf.mxu0 }
  0xb2   :  { %v122_v35 = vadd.f32 %v1423_v29, %v121_v31  ;;  %v337_v31 = vld [vmem:[%s2066_s5 + $0x150] sm:$0xff] }
  0xb3   :  { %410 = vmatpush.msrb.mxu0 %v337_v31  ;;  %v487_v31 = vld [vmem:[#allocation2 + $0xb8] sm:$0xff] }
  0xb4   :  { %v1686_v37 = vmax.f32 %v122_v35, 0.0  ;;  %v302_v35 = vld [vmem:[%s2066_s5 + $0x38] sm:$0xff] }
  0xb6   :  { %v160_v40 = vrot.slane %v1686_v37, 2  ;;  %v140_v42 = vrot.slane %v1686_v37, 1 }
  0xb8   :  { %v161_v44 = vsel %vm158_vm0, %v159_v39, %v160_v40  ;;  %v141_v45 = vsel %vm138_vm2, %v139_v41, %v140_v42  ;;  %v300_v39 = vld [vmem:[%s2066_s5 + $0x28] sm:$0xff]  ;;  %v298_v41 = vld [vmem:[%s2066_s5 + $0x18] sm:$0xff] }
  0xb9   :  { %v124_v46 = vpop.f32.mrf.mxu0  ;;  %1409 = vmatmul.msk.f32.vlgmr.msra.gmra.mxu2 %vm166_vm1, %v161_v44  ;;  %146 = vrot.lane.b32.xlu0 %v141_v45, %s1509_s25  ;;  %v297_v44 = vld [vmem:[%s2066_s5 + $0x10] sm:$0xff]  ;;  %v318_v45 = vld [vmem:[%s2066_s5 + $0xb8] sm:$0xff] }
  0xba   :  { %v125_v48 = vadd.f32 %v1423_v29, %v124_v46  ;;  %v334_v46 = vld [vmem:[%s2066_s5 + $0x138] sm:$0xff] }
  0xbc   :  { %v1708_v50 = vmax.f32 %v125_v48, 0.0  ;;  %v317_v48 = vld [vmem:[%s2066_s5 + $0xb0] sm:$0xff] }
  0xbe   :  { %v142_v52 = vrot.slane %v1708_v50, 1  ;;  %v162_v53 = vrot.slane %v1708_v50, 2 }
  0xc0   :  { %v163_v55 = vsel %vm158_vm0, %v160_v40, %v162_v53  ;;  %v143_v56 = vsel %vm138_vm2, %v140_v42, %v142_v52  ;;  %v299_v40 = vld [vmem:[%s2066_s5 + $0x20] sm:$0xff] }
  0xc1   :  { %v127_v57 = vpop.f32.mrf.mxu0  ;;  %1410 = vmatmul.msk.f32.gmra.mxu2 %vm166_vm1, %v163_v55  ;;  %148 = vrot.lane.b32.xlu0 %v143_v56, %s1509_s25  ;;  %v319_v42 = vld [vmem:[%s2066_s5 + $0xc0] sm:$0xff]  ;;  %v314_v55 = vld [vmem:[%s2066_s5 + $0x98] sm:$0xff] }
  0xc2   :  { %v128_v59 = vadd.f32 %v1423_v29, %v127_v57  ;;  %v304_v29 = vld [vmem:[%s2066_s5 + $0x48] sm:$0xff]  ;;  %383 = vmatpush.msrb.mxu2 %v319_v42  ;;  %v330_v56 = vld [vmem:[%s2066_s5 + $0x118] sm:$0xff]  ;;  %v313_v57 = vld [vmem:[%s2066_s5 + $0x90] sm:$0xff] }
  0xc3   :  { %353 = vmatpush.msra.mxu3 %v304_v29 }
  0xc4   :  { %v1728_v61 = vmax.f32 %v128_v59, 0.0  ;;  %384 = vmatpush.msrb.mxu2 %v318_v45  ;;  %v312_v59 = vld [vmem:[%s2066_s5 + $0x88] sm:$0xff] }
  0xc5   :  { %354 = vmatpush.msra.mxu3 %v303_v32  ;;  %v484_v32 = vld [vmem:[#allocation2 + $0xa0] sm:$0xff] }
  0xc6   :  { %v164_v63 = vrot.slane %v1728_v61, 2  ;;  %v144_v0 = vrot.slane %v1728_v61, 1  ;;  %385 = vmatpush.msrb.mxu2 %v317_v48 }
  0xc7   :  { %355 = vmatpush.msra.mxu3 %v302_v35 }
  0xc8   :  { %v145_v2 = vsel %vm138_vm2, %v142_v52, %v144_v0  ;;  %v165_v3 = vsel %vm158_vm0, %v162_v53, %v164_v63  ;;  %v332_v52 = vld [vmem:[%s2066_s5 + $0x128] sm:$0xff]  ;;  %386 = vmatpush.msrb.mxu2 %v316_v51  ;;  %v315_v53 = vld [vmem:[%s2066_s5 + $0xa0] sm:$0xff] }
  0xc9   :  { %150 = vrot.lane.b32.xlu1 %v145_v2, %s1509_s25  ;;  %1411 = vmatmul.msk.f32.gmra.mxu2 %vm166_vm1, %v165_v3  ;;  %v556_v51 = vld [vmem:[#allocation2 + $0x2e0] sm:$0xff] }
  0xca   :  { %356 = vmatpush.msra.mxu3 %v301_v38  ;;  %387 = vmatpush.msrb.mxu2 %v315_v53  ;;  %v481_v53 = vld [vmem:[#allocation2 + $0x88] sm:$0xff] }
  0xcc   :  { %357 = vmatpush.msra.mxu3 %v300_v39  ;;  %388 = vmatpush.msrb.mxu2 %v314_v55  ;;  %v554_v55 = vld [vmem:[#allocation2 + $0x2d0] sm:$0xff] }
  0xce   :  { %358 = vmatpush.msra.mxu3 %v299_v40  ;;  %389 = vmatpush.msrb.mxu2 %v313_v57  ;;  %v520_v57 = vld [vmem:[#allocation2 + $0x1c0] sm:$0xff] }
  0xd0   :  { %359 = vmatpush.msra.mxu3 %v298_v41  ;;  %390 = vmatpush.msrb.mxu2 %v312_v59  ;;  %v552_v59 = vld [vmem:[#allocation2 + $0x2c0] sm:$0xff] }
  0xd1   :  { %152 = vrot.lane.b32.xlu1 %v144_v0, %s1509_s25  ;;  %1412 = vmatmul.msk.f32.gmra.mxu2 %vm166_vm1, %v164_v63  ;;  %v1424_v0 = vld [vmem:[%s2065_s4] ss:$0 sm:$0xff] }
  0xd2   :  { %360 = vmatpush.msra.mxu3 %v297_v44 }
  0xd4   :  { %361 = vmatpush.msra.mxu3 %v296_v47 }
 0x12b   :  { %v147_v7 = vpop.permute.xlu0 %146 }
 0x12c   :  { %v167_v8 = vsel %vm166_vm1, %v1681_v34, %v147_v7  ;;  %v336_v34 = vld [vmem:[%s2066_s5 + $0x148] sm:$0xff] }
 0x12d   :  { %223 = vmatmul.f32.vlgmr.msra.gmra.mxu1 %v167_v8  ;;  %411 = vmatpush.msrb.mxu0 %v336_v34  ;;  %v494_v8 = vld [vmem:[#allocation2 + $0xf0] sm:$0xff]  ;;  %v485_v34 = vld [vmem:[#allocation2 + $0xa8] sm:$0xff] }
 0x12e   :  { %566 = vmatpush.msrb.mxu1 %v494_v8  ;;  %v470_v8 = vld [vmem:[#allocation2 + $0x30] sm:$0xff] }
 0x12f   :  { %412 = vmatpush.msrb.mxu0 %v335_v43 }
 0x131   :  { %413 = vmatpush.msrb.mxu0 %v334_v46 }
 0x133   :  { %v149_v9 = vpop.permute.xlu0 %148  ;;  %414 = vmatpush.msrb.mxu0 %v333_v49 }
 0x134   :  { %v168_v10 = vsel %vm166_vm1, %v1686_v37, %v149_v9  ;;  %v495_v9 = vld [vmem:[#allocation2 + $0xf8] sm:$0xff] }
 0x135   :  { %226 = vmatmul.f32.gmra.mxu1 %v168_v10  ;;  %415 = vmatpush.msrb.mxu0 %v332_v52  ;;  %v492_v10 = vld [vmem:[#allocation2 + $0xe0] sm:$0xff] }
 0x136   :  { %567 = vmatpush.msrb.mxu1 %v492_v10  ;;  %v480_v52 = vld [vmem:[#allocation2 + $0x80] sm:$0xff] }
 0x137   :  { %416 = vmatpush.msrb.mxu0 %v331_v54  ;;  %v522_v54 = vld [vmem:[#allocation2 + $0x1d0] sm:$0xff]  ;;  %v512_v10 = vld [vmem:[#allocation2 + $0x180] sm:$0xff] }
 0x138   :  { %568 = vmatpush.msrb.mxu1 %v490_v13  ;;  %v469_v13 = vld [vmem:[#allocation2 + $0x28] sm:$0xff] }
 0x139   :  { %417 = vmatpush.msrb.mxu0 %v330_v56  ;;  %v478_v56 = vld [vmem:[#allocation2 + $0x70] sm:$0xff] }
 0x13a   :  { %569 = vmatpush.msrb.mxu1 %v488_v17  ;;  %v467_v17 = vld [vmem:[#allocation2 + $0x18] sm:$0xff] }
 0x13b   :  { %v151_v22 = vpop.permute.xlu1 %150  ;;  %418 = vmatpush.msrb.mxu0 %v329_v58  ;;  %v479_v58 = vld [vmem:[#allocation2 + $0x78] sm:$0xff] }
 0x13c   :  { %v169_v25 = vsel %vm166_vm1, %v1708_v50, %v151_v22  ;;  %v295_v50 = vld [vmem:[%s2066_s5] sm:$0xff]  ;;  %v253_v63 = vpop.f32.mrf.mxu2  ;;  %570 = vmatpush.msrb.mxu1 %v486_v27  ;;  %v525_v27 = vld [vmem:[#allocation2 + $0x1e8] sm:$0xff] }
 0x13d   :  { %229 = vmatmul.f32.gmra.mxu1 %v169_v25  ;;  %362 = vmatpush.msra.mxu3 %v295_v50 }
 0x13e   :  { %419 = vmatpush.msrb.mxu0 %v328_v60  ;;  %571 = vmatpush.msrb.mxu1 %v484_v32  ;;  %v476_v60 = vld [vmem:[#allocation2 + $0x60] sm:$0xff] }
 0x13f   :  { %595 = vmatpush.msrb.mxu3 %v526_v16  ;;  %v466_v16 = vld [vmem:[#allocation2 + $0x10] sm:$0xff]  ;;  %v532_v32 = vld [vmem:[#allocation2 + $0x220] sm:$0xff] }
 0x140   :  { %420 = vmatpush.msrb.mxu0 %v327_v62  ;;  %v518_v62 = vld [vmem:[#allocation2 + $0x1b0] sm:$0xff] }
 0x141   :  { %596 = vmatpush.msrb.mxu3 %v524_v23  ;;  %v538_v23 = vld [vmem:[#allocation2 + $0x250] sm:$0xff] }
 0x142   :  { %653 = vmatpush.msra.mxu0 %v495_v9  ;;  %v471_v9 = vld [vmem:[#allocation2 + $0x38] sm:$0xff] }
 0x143   :  { %v153_v36 = vpop.permute.xlu1 %152  ;;  %597 = vmatpush.msrb.mxu3 %v522_v54  ;;  %v505_v54 = vld [vmem:[#allocation2 + $0x148] sm:$0xff] }
 0x144   :  { %v170_v37 = vsel %vm166_vm1, %v1728_v61, %v153_v36  ;;  %v311_v61 = vld [vmem:[%s2066_s5 + $0x80] sm:$0xff]  ;;  %v256_v5 = vpop.f32.mrf.mxu2  ;;  %654 = vmatpush.msra.mxu0 %v493_v12  ;;  %v482_v36 = vld [vmem:[#allocation2 + $0x90] sm:$0xff] }
 0x145   :  { %232 = vmatmul.f32.gmra.mxu1 %v170_v37  ;;  %391 = vmatpush.msrb.mxu2 %v311_v61  ;;  %v483_v37 = vld [vmem:[#allocation2 + $0x98] sm:$0xff]  ;;  %v477_v61 = vld [vmem:[#allocation2 + $0x68] sm:$0xff]  ;;  %v468_v12 = vld [vmem:[#allocation2 + $0x20] sm:$0xff] }
 0x146   :  { %655 = vmatpush.msra.mxu0 %v491_v15  ;;  %572 = vmatpush.msrb.mxu1 %v482_v36  ;;  %v542_v15 = vld [vmem:[#allocation2 + $0x270] sm:$0xff]  ;;  %v519_v36 = vld [vmem:[#allocation2 + $0x1b8] sm:$0xff] }
 0x147   :  { %624 = vmatpush.msra.mxu2 %v558_v18  ;;  %598 = vmatpush.msrb.mxu3 %v520_v57  ;;  %v508_v18 = vld [vmem:[#allocation2 + $0x160] sm:$0xff]  ;;  %v503_v57 = vld [vmem:[#allocation2 + $0x138] sm:$0xff] }
 0x148   :  { %656 = vmatpush.msra.mxu0 %v489_v26  ;;  %573 = vmatpush.msrb.mxu1 %v480_v52  ;;  %v536_v26 = vld [vmem:[#allocation2 + $0x240] sm:$0xff] }
 0x149   :  { %625 = vmatpush.msra.mxu2 %v556_v51  ;;  %599 = vmatpush.msrb.mxu3 %v518_v62  ;;  %v507_v51 = vld [vmem:[#allocation2 + $0x158] sm:$0xff]  ;;  %v501_v62 = vld [vmem:[#allocation2 + $0x128] sm:$0xff] }
 0x14a   :  { %657 = vmatpush.msra.mxu0 %v487_v31  ;;  %574 = vmatpush.msrb.mxu1 %v478_v56  ;;  %v500_v31 = vld [vmem:[#allocation2 + $0x120] sm:$0xff] }
 0x14b   :  { %626 = vmatpush.msra.mxu2 %v554_v55  ;;  %v547_v55 = vld [vmem:[#allocation2 + $0x298] sm:$0xff] }
 0x14c   :  { %v259_v24 = vpop.f32.mrf.mxu2  ;;  %658 = vmatpush.msra.mxu0 %v485_v34  ;;  %575 = vmatpush.msrb.mxu1 %v476_v60  ;;  %v498_v34 = vld [vmem:[#allocation2 + $0x110] sm:$0xff] }
 0x14d   :  { %627 = vmatpush.msra.mxu2 %v552_v59 }
 0x14e   :  { %659 = vmatpush.msra.mxu0 %v483_v37  ;;  %v496_v37 = vld [vmem:[#allocation2 + $0x100] sm:$0xff] }
 0x150   :  { %660 = vmatpush.msra.mxu0 %v481_v53  ;;  %v549_v53 = vld [vmem:[#allocation2 + $0x2a8] sm:$0xff] }
 0x152   :  { %661 = vmatpush.msra.mxu0 %v479_v58  ;;  %v545_v58 = vld [vmem:[#allocation2 + $0x288] sm:$0xff] }
 0x154   :  { %v262_v44 = vpop.f32.mrf.mxu2  ;;  %662 = vmatpush.msra.mxu0 %v477_v61 }
 0x1aa   :  { %v224_v1 = vpop.f32.mrf.mxu1 }
 0x1ab   :  { %v225_v2 = vadd.f32 %v1424_v0, %v224_v1  ;;  %v516_v1 = vld [vmem:[#allocation2 + $0x1a0] sm:$0xff] }
 0x1ac   :  { %600 = vmatpush.msrb.mxu3 %v516_v1  ;;  %v541_v1 = vld [vmem:[#allocation2 + $0x268] sm:$0xff] }
 0x1ad   :  { %v254_v3 = vadd.f32 %v253_v63, %v225_v2  ;;  %v550_v63 = vld [vmem:[#allocation2 + $0x2b0] sm:$0xff]  ;;  %v475_v2 = vld [vmem:[#allocation2 + $0x58] sm:$0xff] }
 0x1ae   :  { %628 = vmatpush.msra.mxu2 %v550_v63  ;;  %663 = vmatpush.msra.mxu0 %v475_v2  ;;  %v543_v63 = vld [vmem:[#allocation2 + $0x278] sm:$0xff] }
 0x1af   :  { %v265_v4 = vmax.f32 %v254_v3, 0.0  ;;  %v548_v3 = vld [vmem:[#allocation2 + $0x2a0] sm:$0xff] }
 0x1b0   :  { %629 = vmatpush.msra.mxu2 %v548_v3  ;;  %v497_v3 = vld [vmem:[#allocation2 + $0x108] sm:$0xff] }
 0x1b1   :  { %363 = vmatmul.f32.vlgmr.msra.gmra.mxu3 %v265_v4  ;;  %v273_v19 = vrot.slane %v265_v4, 1  ;;  %v284_v21 = vrot.slane %v265_v4, 2  ;;  %v472_v4 = vld [vmem:[#allocation2 + $0x40] sm:$0xff] }
 0x1b2   :  { %v227_v6 = vpop.f32.mrf.mxu1 }
 0x1b3   :  { %v228_v7 = vadd.f32 %v1424_v0, %v227_v6  ;;  %v514_v6 = vld [vmem:[#allocation2 + $0x190] sm:$0xff] }
 0x1b4   :  { %601 = vmatpush.msrb.mxu3 %v514_v6 }
 0x1b5   :  { %v257_v11 = vadd.f32 %v256_v5, %v228_v7  ;;  %v473_v5 = vld [vmem:[#allocation2 + $0x48] sm:$0xff]  ;;  %v546_v7 = vld [vmem:[#allocation2 + $0x290] sm:$0xff] }
 0x1b6   :  { %664 = vmatpush.msra.mxu0 %v473_v5  ;;  %630 = vmatpush.msra.mxu2 %v546_v7  ;;  %v539_v5 = vld [vmem:[#allocation2 + $0x258] sm:$0xff] }
 0x1b7   :  { %v266_v14 = vmax.f32 %v257_v11, 0.0  ;;  %v544_v11 = vld [vmem:[#allocation2 + $0x280] sm:$0xff]  ;;  %602 = vmatpush.msrb.mxu3 %v512_v10 }
 0x1b8   :  { %665 = vmatpush.msra.mxu0 %v471_v9  ;;  %631 = vmatpush.msra.mxu2 %v544_v11 }
 0x1b9   :  { %366 = vmatmul.f32.gmra.mxu3 %v266_v14  ;;  %v274_v20 = vrot.slane %v266_v14, 1  ;;  %v285_v22 = vrot.slane %v266_v14, 2  ;;  %v510_v14 = vld [vmem:[#allocation2 + $0x170] sm:$0xff] }
 0x1ba   :  { %v230_v25 = vpop.f32.mrf.mxu1  ;;  %666 = vmatpush.msra.mxu0 %v469_v13  ;;  %603 = vmatpush.msrb.mxu3 %v510_v14  ;;  %v533_v14 = vld [vmem:[#allocation2 + $0x228] sm:$0xff] }
 0x1bb   :  { %v231_v28 = vadd.f32 %v1424_v0, %v230_v25  ;;  %v275_v29 = vsel %vm138_vm2, %v273_v19, %v274_v20  ;;  %v286_v30 = vsel %vm158_vm0, %v284_v21, %v285_v22  ;;  %632 = vmatpush.msra.mxu2 %v542_v15  ;;  %v540_v19 = vld [vmem:[#allocation2 + $0x260] sm:$0xff]  ;;  %v465_v21 = vld [vmem:[#allocation2 + $0x8] sm:$0xff] }
 0x1bc   :  { %392 = vmatmul.f32.vlgmr.msrb.gmra.mxu2 %v275_v29  ;;  %421 = vmatmul.f32.vlgmr.msrb.gmra.mxu0 %v286_v30  ;;  %v504_v25 = vld [vmem:[#allocation2 + $0x140] sm:$0xff]  ;;  %v534_v29 = vld [vmem:[#allocation2 + $0x230] sm:$0xff]  ;;  %v523_v30 = vld [vmem:[#allocation2 + $0x1d8] sm:$0xff] }
 0x1bd   :  { %v260_v33 = vadd.f32 %v259_v24, %v231_v28  ;;  %667 = vmatpush.msra.mxu0 %v467_v17  ;;  %604 = vmatpush.msrb.mxu3 %v508_v18  ;;  %v527_v24 = vld [vmem:[#allocation2 + $0x1f8] sm:$0xff]  ;;  %v502_v28 = vld [vmem:[#allocation2 + $0x130] sm:$0xff] }
 0x1be   :  { %633 = vmatpush.msra.mxu2 %v540_v19 }
 0x1bf   :  { %v267_v35 = vmax.f32 %v260_v33, 0.0  ;;  %668 = vmatpush.msra.mxu0 %v465_v21  ;;  %v521_v33 = vld [vmem:[#allocation2 + $0x1c8] sm:$0xff] }
 0x1c0   :  { %634 = vmatpush.msra.mxu2 %v538_v23 }
 0x1c1   :  { %369 = vmatmul.f32.gmra.mxu3 %v267_v35  ;;  %v276_v38 = vrot.slane %v267_v35, 1  ;;  %v287_v39 = vrot.slane %v267_v35, 2  ;;  %v530_v35 = vld [vmem:[#allocation2 + $0x210] sm:$0xff] }
 0x1c2   :  { %v233_v40 = vpop.f32.mrf.mxu1  ;;  %635 = vmatpush.msra.mxu2 %v536_v26 }
 0x1c3   :  { %v234_v41 = vadd.f32 %v1424_v0, %v233_v40  ;;  %v277_v42 = vsel %vm138_vm2, %v274_v20, %v276_v38  ;;  %v288_v43 = vsel %vm158_vm0, %v285_v22, %v287_v39  ;;  %v474_v0 = vld [vmem:[#allocation2 + $0x50] sm:$0xff]  ;;  %v464_v20 = vld [vmem:[#allocation2] sm:$0xff]  ;;  %v559_v40 = vld [vmem:[#allocation2 + $0x2f8] sm:$0xff] }
 0x1c4   :  { %395 = vmatmul.f32.gmra.mxu2 %v277_v42  ;;  %424 = vmatmul.f32.gmra.mxu0 %v288_v43  ;;  %v506_v22 = vld [vmem:[#allocation2 + $0x150] sm:$0xff]  ;;  %v557_v42 = vld [vmem:[#allocation2 + $0x2e8] sm:$0xff] }
 0x1c5   :  { %v263_v45 = vadd.f32 %v262_v44, %v234_v41  ;;  %576 = vmatpush.msrb.mxu1 %v474_v0  ;;  %605 = vmatpush.msrb.mxu3 %v506_v22  ;;  %v515_v41 = vld [vmem:[#allocation2 + $0x198] sm:$0xff]  ;;  %v513_v43 = vld [vmem:[#allocation2 + $0x188] sm:$0xff] }
 0x1c6   :  { %636 = vmatpush.msra.mxu2 %v534_v29  ;;  %v555_v44 = vld [vmem:[#allocation2 + $0x2d8] sm:$0xff] }
 0x1c7   :  { %v268_v46 = vmax.f32 %v263_v45, 0.0  ;;  %577 = vmatpush.msrb.mxu1 %v472_v4  ;;  %606 = vmatpush.msrb.mxu3 %v504_v25  ;;  %v499_v0 = vld [vmem:[#allocation2 + $0x118] sm:$0xff] }
 0x1c8   :  { %637 = vmatpush.msra.mxu2 %v532_v32 }
 0x1c9   :  { %372 = vmatmul.f32.gmra.mxu3 %v268_v46  ;;  %v278_v47 = vrot.slane %v268_v46, 1  ;;  %v289_v48 = vrot.slane %v268_v46, 2  ;;  %578 = vmatpush.msrb.mxu1 %v470_v8  ;;  %v511_v46 = vld [vmem:[#allocation2 + $0x178] sm:$0xff]  ;;  %v537_v8 = vld [vmem:[#allocation2 + $0x248] sm:$0xff] }
 0x1ca   :  { %607 = vmatpush.msrb.mxu3 %v502_v28  ;;  %638 = vmatpush.msra.mxu2 %v530_v35 }
 0x1cb   :  { %v279_v49 = vsel %vm138_vm2, %v276_v38, %v278_v47  ;;  %v290_v50 = vsel %vm158_vm0, %v287_v39, %v289_v48  ;;  %579 = vmatpush.msrb.mxu1 %v468_v12  ;;  %v528_v38 = vld [vmem:[#allocation2 + $0x200] sm:$0xff]  ;;  %v517_v39 = vld [vmem:[#allocation2 + $0x1a8] sm:$0xff]  ;;  %v535_v12 = vld [vmem:[#allocation2 + $0x238] sm:$0xff] }
 0x1cc   :  { %398 = vmatmul.f32.gmra.mxu2 %v279_v49  ;;  %427 = vmatmul.f32.gmra.mxu0 %v290_v50  ;;  %v551_v49 = vld [vmem:[#allocation2 + $0x2b8] sm:$0xff]  ;;  %v1917_v50 = vld [vmem:[%s2067_s6] ss:$0 sm:$0xff] }
 0x1cd   :  { %580 = vmatpush.msrb.mxu1 %v466_v16  ;;  %608 = vmatpush.msrb.mxu3 %v500_v31  ;;  %v531_v16 = vld [vmem:[#allocation2 + $0x218] sm:$0xff] }
 0x1ce   :  { %639 = vmatpush.msra.mxu2 %v528_v38 }
 0x1cf   :  { %581 = vmatpush.msrb.mxu1 %v464_v20  ;;  %609 = vmatpush.msrb.mxu3 %v498_v34 }
 0x1d1   :  { %682 = vmatpush.msra.mxu1 %v527_v24  ;;  %610 = vmatpush.msrb.mxu3 %v496_v37  ;;  %v529_v24 = vld [vmem:[#allocation2 + $0x208] sm:$0xff] }
 0x1d3   :  { %683 = vmatpush.msra.mxu1 %v525_v27  ;;  %711 = vmatpush.msra.mxu3 %v559_v40 }
 0x1d4   :  { %401 = vmatmul.f32.gmra.mxu2 %v278_v47  ;;  %430 = vmatmul.f32.gmra.mxu0 %v289_v48  ;;  %v553_v47 = vld [vmem:[#allocation2 + $0x2c8] sm:$0xff] }
 0x1d5   :  { %684 = vmatpush.msra.mxu1 %v523_v30  ;;  %712 = vmatpush.msra.mxu3 %v557_v42  ;;  %v509_v48 = vld [vmem:[#allocation2 + $0x168] sm:$0xff] }
 0x1d7   :  { %685 = vmatpush.msra.mxu1 %v521_v33  ;;  %713 = vmatpush.msra.mxu3 %v555_v44 }
 0x1d9   :  { %686 = vmatpush.msra.mxu1 %v519_v36  ;;  %714 = vmatpush.msra.mxu3 %v553_v47  ;;  %v822_v47 = vld [vmem:[#allocation5 + $0xd0] sm:$0xff] }
 0x1db   :  { %687 = vmatpush.msra.mxu1 %v517_v39  ;;  %715 = vmatpush.msra.mxu3 %v551_v49  ;;  %v888_v49 = vld [vmem:[#allocation5 + $0x2e0] sm:$0xff] }
 0x1dd   :  { %688 = vmatpush.msra.mxu1 %v515_v41  ;;  %716 = vmatpush.msra.mxu3 %v549_v53  ;;  %v884_v53 = vld [vmem:[#allocation5 + $0x2c0] sm:$0xff] }
 0x1df   :  { %689 = vmatpush.msra.mxu1 %v513_v43  ;;  %717 = vmatpush.msra.mxu3 %v547_v55  ;;  %v882_v55 = vld [vmem:[#allocation5 + $0x2b0] sm:$0xff] }
 0x1e1   :  { %690 = vmatpush.msra.mxu1 %v511_v46  ;;  %718 = vmatpush.msra.mxu3 %v545_v58  ;;  %v824_v46 = vld [vmem:[#allocation5 + $0xe0] sm:$0xff]  ;;  %v810_v58 = vld [vmem:[#allocation5 + $0x70] sm:$0xff] }
 0x1e3   :  { %691 = vmatpush.msra.mxu1 %v509_v48  ;;  %719 = vmatpush.msra.mxu3 %v543_v63  ;;  %v890_v48 = vld [vmem:[#allocation5 + $0x2f0] sm:$0xff] }
 0x1e4   :  { %v878_v63 = vld [vmem:[#allocation5 + $0x290] sm:$0xff] }
 0x1e5   :  { %692 = vmatpush.msra.mxu1 %v507_v51  ;;  %720 = vmatpush.msra.mxu3 %v541_v1  ;;  %v886_v51 = vld [vmem:[#allocation5 + $0x2d0] sm:$0xff]  ;;  %v876_v1 = vld [vmem:[#allocation5 + $0x280] sm:$0xff] }
 0x1e7   :  { %693 = vmatpush.msra.mxu1 %v505_v54  ;;  %721 = vmatpush.msra.mxu3 %v539_v5  ;;  %v816_v54 = vld [vmem:[#allocation5 + $0xa0] sm:$0xff] }
 0x1e8   :  { %v872_v5 = vld [vmem:[#allocation5 + $0x260] sm:$0xff] }
 0x1e9   :  { %694 = vmatpush.msra.mxu1 %v503_v57  ;;  %722 = vmatpush.msra.mxu3 %v537_v8  ;;  %v812_v57 = vld [vmem:[#allocation5 + $0x80] sm:$0xff]  ;;  %v870_v8 = vld [vmem:[#allocation5 + $0x250] sm:$0xff] }
 0x1eb   :  { %695 = vmatpush.msra.mxu1 %v501_v62  ;;  %723 = vmatpush.msra.mxu3 %v535_v12  ;;  %v804_v62 = vld [vmem:[#allocation5 + $0x40] sm:$0xff] }
 0x1ec   :  { %v952_v12 = vld [vmem:[#allocation5 + $0x4e0] sm:$0xff] }
 0x1ed   :  { %696 = vmatpush.msra.mxu1 %v499_v0  ;;  %724 = vmatpush.msra.mxu3 %v533_v14  ;;  %v802_v0 = vld [vmem:[#allocation5 + $0x30] sm:$0xff] }
 0x1ee   :  { %v866_v14 = vld [vmem:[#allocation5 + $0x230] sm:$0xff] }
 0x1ef   :  { %697 = vmatpush.msra.mxu1 %v497_v3  ;;  %725 = vmatpush.msra.mxu3 %v531_v16  ;;  %v874_v3 = vld [vmem:[#allocation5 + $0x270] sm:$0xff]  ;;  %v852_v16 = vld [vmem:[#allocation5 + $0x1c0] sm:$0xff] }
 0x1f1   :  { %726 = vmatpush.msra.mxu3 %v529_v24  ;;  %v922_v24 = vld [vmem:[#allocation5 + $0x3f0] sm:$0xff] }
 0x234   :  { %v364_v45 = vpop.f32.mrf.mxu3 }
 0x235   :  { %v365_v56 = vadd.f32 %v1917_v50, %v364_v45  ;;  %v826_v45 = vld [vmem:[#allocation5 + $0xf0] sm:$0xff] }
 0x236   :  { %994 = vmatpush.msrb.mxu2 %v826_v45  ;;  %v934_v45 = vld [vmem:[#allocation5 + $0x450] sm:$0xff] }
 0x238   :  { %995 = vmatpush.msrb.mxu2 %v824_v46  ;;  %v836_v46 = vld [vmem:[#allocation5 + $0x140] sm:$0xff] }
 0x239   :  { %v422_v52 = vpop.f32.mrf.mxu0 }
 0x23a   :  { %996 = vmatpush.msrb.mxu2 %v822_v47  ;;  %v817_v47 = vld [vmem:[#allocation5 + $0xa8] sm:$0xff] }
 0x23c   :  { %v367_v59 = vpop.f32.mrf.mxu3 }
 0x23d   :  { %v368_v7 = vadd.f32 %v1917_v50, %v367_v59  ;;  %v808_v59 = vld [vmem:[#allocation5 + $0x60] sm:$0xff] }
 0x23f   :  { %v393_v60 = vpop.f32.mrf.mxu2 }
 0x240   :  { %v394_v61 = vadd.f32 %v393_v60, %v365_v56  ;;  %v814_v56 = vld [vmem:[#allocation5 + $0x90] sm:$0xff] }
 0x241   :  { %v425_v6 = vpop.f32.mrf.mxu0  ;;  %v806_v60 = vld [vmem:[#allocation5 + $0x50] sm:$0xff] }
 0x242   :  { %v423_v2 = vadd.f32 %v422_v52, %v394_v61  ;;  %v818_v52 = vld [vmem:[#allocation5 + $0xb0] sm:$0xff]  ;;  %v880_v61 = vld [vmem:[#allocation5 + $0x2a0] sm:$0xff] }
 0x244   :  { %v434_v4 = vmax.f32 %v423_v2, 0.0  ;;  %v370_v11 = vpop.f32.mrf.mxu3  ;;  %v800_v2 = vld [vmem:[#allocation5 + $0x20] sm:$0xff] }
 0x245   :  { %v371_v17 = vadd.f32 %v1917_v50, %v370_v11  ;;  %v868_v11 = vld [vmem:[#allocation5 + $0x240] sm:$0xff] }
 0x246   :  { %582 = vmatmul.f32.vlgmr.msrb.gmra.mxu1 %v434_v4  ;;  %669 = vmatmul.f32.vlgmr.msra.gmra.mxu0 %v434_v4  ;;  %v442_v18 = vrot.slane %v434_v4, 1  ;;  %v453_v20 = vrot.slane %v434_v4, 2  ;;  %v798_v4 = vld [vmem:[#allocation5 + $0x10] sm:$0xff] }
 0x247   :  { %v396_v9 = vpop.f32.mrf.mxu2  ;;  %1044 = vmatpush.msrb.mxu1 %v890_v48  ;;  %v910_v48 = vld [vmem:[#allocation5 + $0x390] sm:$0xff] }
 0x248   :  { %v397_v10 = vadd.f32 %v396_v9, %v368_v7  ;;  %v858_v7 = vld [vmem:[#allocation5 + $0x1f0] sm:$0xff] }
 0x249   :  { %v428_v22 = vpop.f32.mrf.mxu0  ;;  %1045 = vmatpush.msrb.mxu1 %v888_v49  ;;  %1019 = vmatpush.msrb.mxu0 %v858_v7  ;;  %v954_v9 = vld [vmem:[#allocation5 + $0x4f0] sm:$0xff]  ;;  %v932_v49 = vld [vmem:[#allocation5 + $0x440] sm:$0xff] }
 0x24a   :  { %v426_v13 = vadd.f32 %v425_v6, %v397_v10  ;;  %v796_v6 = vld [vmem:[#allocation5] sm:$0xff] }
 0x24b   :  { %1046 = vmatpush.msrb.mxu1 %v886_v51  ;;  %v856_v10 = vld [vmem:[#allocation5 + $0x1e0] sm:$0xff]  ;;  %v834_v51 = vld [vmem:[#allocation5 + $0x130] sm:$0xff] }
 0x24c   :  { %v435_v15 = vmax.f32 %v426_v13, 0.0  ;;  %v373_v29 = vpop.f32.mrf.mxu3  ;;  %v854_v13 = vld [vmem:[#allocation5 + $0x1d0] sm:$0xff]  ;;  %1020 = vmatpush.msrb.mxu0 %v856_v10  ;;  %v900_v7 = vld [vmem:[#allocation5 + $0x340] sm:$0xff] }
 0x24d   :  { %v374_v31 = vadd.f32 %v1917_v50, %v373_v29  ;;  %v820_v50 = vld [vmem:[#allocation5 + $0xc0] sm:$0xff]  ;;  %1047 = vmatpush.msrb.mxu1 %v884_v53  ;;  %v942_v29 = vld [vmem:[#allocation5 + $0x490] sm:$0xff] }
 0x24e   :  { %585 = vmatmul.f32.gmra.mxu1 %v435_v15  ;;  %672 = vmatmul.f32.gmra.mxu0 %v435_v15  ;;  %v443_v19 = vrot.slane %v435_v15, 1  ;;  %v454_v21 = vrot.slane %v435_v15, 2  ;;  %v950_v15 = vld [vmem:[#allocation5 + $0x4d0] sm:$0xff]  ;;  %v908_v53 = vld [vmem:[#allocation5 + $0x380] sm:$0xff] }
 0x24f   :  { %v399_v23 = vpop.f32.mrf.mxu2  ;;  %997 = vmatpush.msrb.mxu2 %v820_v50  ;;  %1048 = vmatpush.msrb.mxu1 %v882_v55  ;;  %v832_v55 = vld [vmem:[#allocation5 + $0x120] sm:$0xff]  ;;  %v898_v10 = vld [vmem:[#allocation5 + $0x330] sm:$0xff] }
 0x250   :  { %v400_v25 = vadd.f32 %v399_v23, %v371_v17  ;;  %v444_v26 = vsel %vm138_vm2, %v442_v18, %v443_v19  ;;  %v455_v27 = vsel %vm158_vm0, %v453_v20, %v454_v21  ;;  %1021 = vmatpush.msrb.mxu0 %v854_v13  ;;  %v864_v17 = vld [vmem:[#allocation5 + $0x220] sm:$0xff]  ;;  %v862_v20 = vld [vmem:[#allocation5 + $0x210] sm:$0xff]  ;;  %v803_v13 = vld [vmem:[#allocation5 + $0x38] sm:$0xff] }
 0x251   :  { %611 = vmatmul.f32.vlgmr.msrb.gmra.mxu3 %v444_v26  ;;  %640 = vmatmul.f32.vlgmr.msra.gmra.mxu2 %v455_v27  ;;  %v431_v38 = vpop.f32.mrf.mxu0  ;;  %v948_v18 = vld [vmem:[#allocation5 + $0x4c0] sm:$0xff] }
 0x252   :  { %v429_v28 = vadd.f32 %v428_v22, %v400_v25  ;;  %998 = vmatpush.msrb.mxu2 %v818_v52  ;;  %1049 = vmatpush.msrb.mxu1 %v880_v61  ;;  %v848_v22 = vld [vmem:[#allocation5 + $0x1a0] sm:$0xff]  ;;  %v815_v52 = vld [vmem:[#allocation5 + $0x98] sm:$0xff] }
 0x253   :  { %1022 = vmatpush.msrb.mxu0 %v852_v16  ;;  %v860_v23 = vld [vmem:[#allocation5 + $0x200] sm:$0xff]  ;;  %1069 = vmatpush.msrb.mxu3 %v922_v24  ;;  %v801_v16 = vld [vmem:[#allocation5 + $0x28] sm:$0xff] }
 0x254   :  { %v436_v30 = vmax.f32 %v429_v28, 0.0  ;;  %999 = vmatpush.msrb.mxu2 %v816_v54  ;;  %1050 = vmatpush.msrb.mxu1 %v878_v63  ;;  %v944_v25 = vld [vmem:[#allocation5 + $0x4a0] sm:$0xff]  ;;  %v930_v54 = vld [vmem:[#allocation5 + $0x430] sm:$0xff] }
 0x255   :  { %v920_v28 = vld [vmem:[#allocation5 + $0x3e0] sm:$0xff] }
 0x256   :  { %588 = vmatmul.f32.gmra.mxu1 %v436_v30  ;;  %675 = vmatmul.f32.gmra.mxu0 %v436_v30  ;;  %v445_v32 = vrot.slane %v436_v30, 1  ;;  %v456_v33 = vrot.slane %v436_v30, 2  ;;  %v844_v30 = vld [vmem:[#allocation5 + $0x180] sm:$0xff] }
 0x257   :  { %v402_v34 = vpop.f32.mrf.mxu2  ;;  %1000 = vmatpush.msrb.mxu2 %v814_v56  ;;  %1051 = vmatpush.msrb.mxu1 %v876_v1  ;;  %v813_v56 = vld [vmem:[#allocation5 + $0x88] sm:$0xff]  ;;  %v904_v61 = vld [vmem:[#allocation5 + $0x360] sm:$0xff]  ;;  %v902_v1 = vld [vmem:[#allocation5 + $0x350] sm:$0xff] }
 0x258   :  { %v403_v35 = vadd.f32 %v402_v34, %v374_v31  ;;  %v446_v36 = vsel %vm138_vm2, %v443_v19, %v445_v32  ;;  %v457_v37 = vsel %vm158_vm0, %v454_v21, %v456_v33  ;;  %v850_v19 = vld [vmem:[#allocation5 + $0x1b0] sm:$0xff]  ;;  %1070 = vmatpush.msrb.mxu3 %v920_v28  ;;  %v825_v31 = vld [vmem:[#allocation5 + $0xe8] sm:$0xff]  ;;  %v828_v63 = vld [vmem:[#allocation5 + $0x100] sm:$0xff] }
 0x259   :  { %614 = vmatmul.f32.gmra.mxu3 %v446_v36  ;;  %643 = vmatmul.f32.gmra.mxu2 %v457_v37  ;;  %v946_v21 = vld [vmem:[#allocation5 + $0x4b0] sm:$0xff]  ;;  %v976_v24 = vld [vmem:[#allocation5 + $0x5a0] sm:$0xff] }
 0x25a   :  { %v432_v39 = vadd.f32 %v431_v38, %v403_v35  ;;  %1001 = vmatpush.msrb.mxu2 %v812_v57  ;;  %1052 = vmatpush.msrb.mxu1 %v874_v3  ;;  %v842_v34 = vld [vmem:[#allocation5 + $0x170] sm:$0xff]  ;;  %v823_v35 = vld [vmem:[#allocation5 + $0xd8] sm:$0xff]  ;;  %v840_v38 = vld [vmem:[#allocation5 + $0x160] sm:$0xff] }
 0x25b   :  { %1023 = vmatpush.msrb.mxu0 %v850_v19  ;;  %v906_v57 = vld [vmem:[#allocation5 + $0x370] sm:$0xff] }
 0x25c   :  { %v437_v40 = vmax.f32 %v432_v39, 0.0  ;;  %1002 = vmatpush.msrb.mxu2 %v810_v58  ;;  %1053 = vmatpush.msrb.mxu1 %v872_v5  ;;  %v821_v39 = vld [vmem:[#allocation5 + $0xc8] sm:$0xff]  ;;  %v928_v58 = vld [vmem:[#allocation5 + $0x420] sm:$0xff]  ;;  %v986_v3 = vld [vmem:[#allocation5 + $0x5f0] sm:$0xff] }
 0x25d   :  { %1024 = vmatpush.msrb.mxu0 %v848_v22  ;;  %v1932_v5 = vld [vmem:[%s2069_s8] sm:$0x3] }
 0x25e   :  { %591 = vmatmul.f32.gmra.mxu1 %v437_v40  ;;  %678 = vmatmul.f32.gmra.mxu0 %v437_v40  ;;  %v447_v41 = vrot.slane %v437_v40, 1  ;;  %v458_v42 = vrot.slane %v437_v40, 2  ;;  %v914_v40 = vld [vmem:[#allocation5 + $0x3b0] sm:$0xff] }
 0x25f   :  { %1003 = vmatpush.msrb.mxu2 %v808_v59  ;;  %1054 = vmatpush.msrb.mxu1 %v870_v8  ;;  %v830_v59 = vld [vmem:[#allocation5 + $0x110] sm:$0xff]  ;;  %v984_v8 = vld [vmem:[#allocation5 + $0x5e0] sm:$0xff] }
 0x260   :  { %v448_v43 = vsel %vm138_vm2, %v445_v32, %v447_v41  ;;  %v459_v44 = vsel %vm158_vm0, %v456_v33, %v458_v42  ;;  %v918_v32 = vld [vmem:[#allocation5 + $0x3d0] sm:$0xff]  ;;  %v940_v33 = vld [vmem:[#allocation5 + $0x480] sm:$0xff] }
 0x261   :  { %617 = vmatmul.f32.gmra.mxu3 %v448_v43  ;;  %646 = vmatmul.f32.gmra.mxu2 %v459_v44 }
 0x262   :  { %1004 = vmatpush.msrb.mxu2 %v806_v60  ;;  %1055 = vmatpush.msrb.mxu1 %v868_v11  ;;  %v811_v60 = vld [vmem:[#allocation5 + $0x78] sm:$0xff]  ;;  %v982_v11 = vld [vmem:[#allocation5 + $0x5d0] sm:$0xff] }
 0x263   :  { %1071 = vmatpush.msrb.mxu3 %v918_v32  ;;  %v972_v32 = vld [vmem:[#allocation5 + $0x580] sm:$0xff] }
 0x264   :  { %1005 = vmatpush.msrb.mxu2 %v804_v62  ;;  %1056 = vmatpush.msrb.mxu1 %v866_v14  ;;  %v926_v62 = vld [vmem:[#allocation5 + $0x410] sm:$0xff]  ;;  %v896_v14 = vld [vmem:[#allocation5 + $0x320] sm:$0xff] }
 0x266   :  { %698 = vmatmul.f32.vlgmr.msra.gmra.mxu1 %v444_v26  ;;  %1006 = vmatpush.msrb.mxu2 %v802_v0  ;;  %v846_v26 = vld [vmem:[#allocation5 + $0x190] sm:$0xff]  ;;  %v809_v0 = vld [vmem:[#allocation5 + $0x68] sm:$0xff] }
 0x267   :  { %1057 = vmatpush.msrb.mxu1 %v864_v17  ;;  %1025 = vmatpush.msrb.mxu0 %v846_v26  ;;  %v894_v17 = vld [vmem:[#allocation5 + $0x310] sm:$0xff]  ;;  %v797_v26 = vld [vmem:[#allocation5 + $0x8] sm:$0xff] }
 0x268   :  { %1007 = vmatpush.msrb.mxu2 %v800_v2  ;;  %v924_v2 = vld [vmem:[#allocation5 + $0x400] sm:$0xff] }
 0x269   :  { %620 = vmatmul.f32.gmra.mxu3 %v447_v41  ;;  %649 = vmatmul.f32.gmra.mxu2 %v458_v42 }
 0x26a   :  { %1008 = vmatpush.msrb.mxu2 %v798_v4  ;;  %1058 = vmatpush.msrb.mxu1 %v862_v20  ;;  %v807_v4 = vld [vmem:[#allocation5 + $0x58] sm:$0xff] }
 0x26b   :  { %1026 = vmatpush.msrb.mxu0 %v844_v30  ;;  %v799_v20 = vld [vmem:[#allocation5 + $0x18] sm:$0xff] }
 0x26c   :  { %1009 = vmatpush.msrb.mxu2 %v796_v6  ;;  %1059 = vmatpush.msrb.mxu1 %v860_v23  ;;  %v892_v23 = vld [vmem:[#allocation5 + $0x300] sm:$0xff] }
 0x26d   :  { %1027 = vmatpush.msrb.mxu0 %v842_v34  ;;  %v891_v34 = vld [vmem:[#allocation5 + $0x2f8] sm:$0xff] }
 0x26e   :  { %701 = vmatmul.f32.gmra.mxu1 %v446_v36  ;;  %1094 = vmatpush.msra.mxu2 %v954_v9  ;;  %v916_v36 = vld [vmem:[#allocation5 + $0x3c0] sm:$0xff]  ;;  %v805_v9 = vld [vmem:[#allocation5 + $0x48] sm:$0xff] }
 0x26f   :  { %1072 = vmatpush.msrb.mxu3 %v916_v36  ;;  %1028 = vmatpush.msrb.mxu0 %v840_v38  ;;  %v970_v36 = vld [vmem:[#allocation5 + $0x570] sm:$0xff]  ;;  %v889_v38 = vld [vmem:[#allocation5 + $0x2e8] sm:$0xff] }
 0x270   :  { %1095 = vmatpush.msra.mxu2 %v952_v12  ;;  %v1935_v12 = vperm.slane %v1932_v5, 0 }
 0x271   :  { %727 = vmatmul.f32.vlgmr.msra.gmra.mxu3 %v455_v27  ;;  %v827_v27 = vld [vmem:[#allocation5 + $0xf8] sm:$0xff] }
 0x272   :  { %1096 = vmatpush.msra.mxu2 %v950_v15  ;;  %1144 = vmatpush.msra.mxu1 %v827_v27  ;;  %v980_v15 = vld [vmem:[#allocation5 + $0x5c0] sm:$0xff]  ;;  %v859_v27 = vld [vmem:[#allocation5 + $0x1f8] sm:$0xff] }
 0x273   :  { %1073 = vmatpush.msrb.mxu3 %v914_v40 }
 0x274   :  { %1097 = vmatpush.msra.mxu2 %v948_v18  ;;  %1145 = vmatpush.msra.mxu1 %v825_v31  ;;  %v978_v18 = vld [vmem:[#allocation5 + $0x5b0] sm:$0xff]  ;;  %v857_v31 = vld [vmem:[#allocation5 + $0x1e8] sm:$0xff] }
 0x276   :  { %704 = vmatmul.f32.gmra.mxu1 %v448_v43  ;;  %1098 = vmatpush.msra.mxu2 %v946_v21  ;;  %v819_v43 = vld [vmem:[#allocation5 + $0xb8] sm:$0xff] }
 0x277   :  { %1146 = vmatpush.msra.mxu1 %v823_v35  ;;  %v855_v35 = vld [vmem:[#allocation5 + $0x1d8] sm:$0xff] }
 0x278   :  { %1099 = vmatpush.msra.mxu2 %v944_v25 }
 0x279   :  { %730 = vmatmul.f32.gmra.mxu3 %v457_v37  ;;  %v938_v37 = vld [vmem:[#allocation5 + $0x470] sm:$0xff]  ;;  %1147 = vmatpush.msra.mxu1 %v821_v39  ;;  %v853_v39 = vld [vmem:[#allocation5 + $0x1c8] sm:$0xff] }
 0x27a   :  { %1100 = vmatpush.msra.mxu2 %v942_v29  ;;  %v974_v29 = vld [vmem:[#allocation5 + $0x590] sm:$0xff] }
 0x27b   :  { %1148 = vmatpush.msra.mxu1 %v819_v43 }
 0x27c   :  { %1101 = vmatpush.msra.mxu2 %v940_v33 }
 0x27d   :  { %1149 = vmatpush.msra.mxu1 %v817_v47 }
 0x27e   :  { %707 = vmatmul.f32.gmra.mxu1 %v447_v41  ;;  %1102 = vmatpush.msra.mxu2 %v938_v37  ;;  %v936_v41 = vld [vmem:[#allocation5 + $0x460] sm:$0xff] }
 0x27f   :  { %1150 = vmatpush.msra.mxu1 %v815_v52 }
 0x280   :  { %1103 = vmatpush.msra.mxu2 %v936_v41 }
 0x281   :  { %733 = vmatmul.f32.gmra.mxu3 %v459_v44  ;;  %v912_v44 = vld [vmem:[#allocation5 + $0x3a0] sm:$0xff]  ;;  %1151 = vmatpush.msra.mxu1 %v813_v56 }
 0x282   :  { %1074 = vmatpush.msrb.mxu3 %v912_v44  ;;  %1104 = vmatpush.msra.mxu2 %v934_v45  ;;  %v887_v44 = vld [vmem:[#allocation5 + $0x2d8] sm:$0xff] }
 0x283   :  { %1152 = vmatpush.msra.mxu1 %v811_v60  ;;  %v851_v45 = vld [vmem:[#allocation5 + $0x1b8] sm:$0xff]  ;;  %v845_v60 = vld [vmem:[#allocation5 + $0x188] sm:$0xff] }
 0x284   :  { %1075 = vmatpush.msrb.mxu3 %v910_v48  ;;  %1105 = vmatpush.msra.mxu2 %v932_v49  ;;  %v885_v48 = vld [vmem:[#allocation5 + $0x2c8] sm:$0xff] }
 0x285   :  { %1153 = vmatpush.msra.mxu1 %v809_v0  ;;  %v849_v49 = vld [vmem:[#allocation5 + $0x1a8] sm:$0xff]  ;;  %v960_v0 = vld [vmem:[#allocation5 + $0x520] sm:$0xff] }
 0x286   :  { %1076 = vmatpush.msrb.mxu3 %v908_v53  ;;  %1106 = vmatpush.msra.mxu2 %v930_v54  ;;  %v883_v53 = vld [vmem:[#allocation5 + $0x2b8] sm:$0xff] }
 0x287   :  { %1154 = vmatpush.msra.mxu1 %v807_v4  ;;  %v847_v54 = vld [vmem:[#allocation5 + $0x198] sm:$0xff] }
 0x288   :  { %1077 = vmatpush.msrb.mxu3 %v906_v57  ;;  %1107 = vmatpush.msra.mxu2 %v928_v58  ;;  %v843_v4 = vld [vmem:[#allocation5 + $0x178] sm:$0xff] }
 0x289   :  { %736 = vmatmul.f32.gmra.mxu3 %v458_v42  ;;  %v838_v42 = vld [vmem:[#allocation5 + $0x150] sm:$0xff]  ;;  %1155 = vmatpush.msra.mxu1 %v805_v9  ;;  %v877_v9 = vld [vmem:[#allocation5 + $0x288] sm:$0xff] }
 0x28a   :  { %1029 = vmatpush.msrb.mxu0 %v838_v42  ;;  %1078 = vmatpush.msrb.mxu3 %v904_v61  ;;  %v968_v42 = vld [vmem:[#allocation5 + $0x560] sm:$0xff] }
 0x28b   :  { %1108 = vmatpush.msra.mxu2 %v926_v62  ;;  %1156 = vmatpush.msra.mxu1 %v803_v13  ;;  %v951_v13 = vld [vmem:[#allocation5 + $0x4d8] sm:$0xff] }
 0x28c   :  { %1030 = vmatpush.msrb.mxu0 %v836_v46  ;;  %1079 = vmatpush.msrb.mxu3 %v902_v1  ;;  %v966_v46 = vld [vmem:[#allocation5 + $0x550] sm:$0xff] }
 0x28d   :  { %1109 = vmatpush.msra.mxu2 %v924_v2  ;;  %1157 = vmatpush.msra.mxu1 %v801_v16  ;;  %v956_v16 = vld [vmem:[#allocation5 + $0x500] sm:$0xff] }
 0x28e   :  { %1031 = vmatpush.msrb.mxu0 %v834_v51  ;;  %1080 = vmatpush.msrb.mxu3 %v900_v7  ;;  %v964_v51 = vld [vmem:[#allocation5 + $0x540] sm:$0xff]  ;;  %v958_v7 = vld [vmem:[#allocation5 + $0x510] sm:$0xff] }
 0x28f   :  { %1158 = vmatpush.msra.mxu1 %v799_v20 }
 0x290   :  { %1032 = vmatpush.msrb.mxu0 %v832_v55  ;;  %1081 = vmatpush.msrb.mxu3 %v898_v10  ;;  %v962_v55 = vld [vmem:[#allocation5 + $0x530] sm:$0xff]  ;;  %v841_v10 = vld [vmem:[#allocation5 + $0x168] sm:$0xff] }
 0x291   :  { %1159 = vmatpush.msra.mxu1 %v797_v26  ;;  %v1958_v26 = vperm.slane %v1932_v5, 1  ;;  %v869_v5 = vld [vmem:[#allocation5 + $0x248] sm:$0xff] }
 0x292   :  { %1033 = vmatpush.msrb.mxu0 %v830_v59  ;;  %1082 = vmatpush.msrb.mxu3 %v896_v14  ;;  %v881_v59 = vld [vmem:[#allocation5 + $0x2a8] sm:$0xff] }
 0x294   :  { %1034 = vmatpush.msrb.mxu0 %v828_v63  ;;  %1083 = vmatpush.msrb.mxu3 %v894_v17  ;;  %v955_v63 = vld [vmem:[#allocation5 + $0x4f8] sm:$0xff] }
 0x296   :  { %1119 = vmatpush.msra.mxu0 %v986_v3  ;;  %1084 = vmatpush.msrb.mxu3 %v892_v23  ;;  %v879_v3 = vld [vmem:[#allocation5 + $0x298] sm:$0xff] }
 0x298   :  { %1120 = vmatpush.msra.mxu0 %v984_v8  ;;  %1169 = vmatpush.msra.mxu3 %v859_v27 }
 0x29a   :  { %1121 = vmatpush.msra.mxu0 %v982_v11  ;;  %1170 = vmatpush.msra.mxu3 %v857_v31  ;;  %v945_v31 = vld [vmem:[#allocation5 + $0x4a8] sm:$0xff] }
 0x29c   :  { %1122 = vmatpush.msra.mxu0 %v980_v15  ;;  %1171 = vmatpush.msra.mxu3 %v855_v35  ;;  %v875_v15 = vld [vmem:[#allocation5 + $0x278] sm:$0xff] }
 0x29e   :  { %1123 = vmatpush.msra.mxu0 %v978_v18  ;;  %1172 = vmatpush.msra.mxu3 %v853_v39  ;;  %v949_v18 = vld [vmem:[#allocation5 + $0x4c8] sm:$0xff]  ;;  %v867_v39 = vld [vmem:[#allocation5 + $0x238] sm:$0xff] }
 0x2a0   :  { %1124 = vmatpush.msra.mxu0 %v976_v24  ;;  %1173 = vmatpush.msra.mxu3 %v851_v45  ;;  %v947_v24 = vld [vmem:[#allocation5 + $0x4b8] sm:$0xff] }
 0x2a2   :  { %1125 = vmatpush.msra.mxu0 %v974_v29  ;;  %1174 = vmatpush.msra.mxu3 %v849_v49  ;;  %v939_v49 = vld [vmem:[#allocation5 + $0x478] sm:$0xff] }
 0x2a4   :  { %1126 = vmatpush.msra.mxu0 %v972_v32  ;;  %1175 = vmatpush.msra.mxu3 %v847_v54  ;;  %v835_v32 = vld [vmem:[#allocation5 + $0x138] sm:$0xff] }
 0x2a5   :  { %v863_v54 = vld [vmem:[#allocation5 + $0x218] sm:$0xff] }
 0x2a6   :  { %1127 = vmatpush.msra.mxu0 %v970_v36  ;;  %1176 = vmatpush.msra.mxu3 %v845_v60  ;;  %v943_v36 = vld [vmem:[#allocation5 + $0x498] sm:$0xff] }
 0x2a7   :  { %v935_v60 = vld [vmem:[#allocation5 + $0x458] sm:$0xff] }
 0x2a8   :  { %1128 = vmatpush.msra.mxu0 %v968_v42  ;;  %1177 = vmatpush.msra.mxu3 %v843_v4  ;;  %v919_v4 = vld [vmem:[#allocation5 + $0x3d8] sm:$0xff] }
 0x2aa   :  { %1129 = vmatpush.msra.mxu0 %v966_v46  ;;  %1178 = vmatpush.msra.mxu3 %v841_v10  ;;  %v865_v46 = vld [vmem:[#allocation5 + $0x228] sm:$0xff] }
 0x2ab   :  { %v917_v10 = vld [vmem:[#allocation5 + $0x3c8] sm:$0xff] }
 0x2ac   :  { %1130 = vmatpush.msra.mxu0 %v964_v51 }
 0x2ae   :  { %1131 = vmatpush.msra.mxu0 %v962_v55 }
 0x2b0   :  { %1132 = vmatpush.msra.mxu0 %v960_v0 }
 0x2b2   :  { %1133 = vmatpush.msra.mxu0 %v958_v7 }
 0x2b4   :  { %1134 = vmatpush.msra.mxu0 %v956_v16 }
 0x2c3   :  { %v583_v50 = vpop.f32.mrf.mxu1  ;;  %v670_v11 = vpop.f32.mrf.mxu0 }
 0x2c4   :  { %v584_v19 = vadd.f32 %v583_v50, %v1935_v12 }
 0x2cb   :  { %v586_v6 = vpop.f32.mrf.mxu1 }
 0x2cc   :  { %v587_v37 = vadd.f32 %v586_v6, %v1935_v12  ;;  %v953_v6 = vld [vmem:[#allocation5 + $0x4e8] sm:$0xff] }
 0x2d3   :  { %v589_v28 = vpop.f32.mrf.mxu1 }
 0x2d4   :  { %v612_v21 = vpop.f32.mrf.mxu3  ;;  %v641_v22 = vpop.f32.mrf.mxu2  ;;  %v590_v56 = vadd.f32 %v589_v28, %v1935_v12 }
 0x2d5   :  { %v613_v25 = vadd.f32 %v612_v21, %v584_v19  ;;  %v839_v19 = vld [vmem:[#allocation5 + $0x158] sm:$0xff] }
 0x2d6   :  { %1179 = vmatpush.msra.mxu3 %v839_v19 }
 0x2d7   :  { %v642_v30 = vadd.f32 %v641_v22, %v613_v25  ;;  %v873_v22 = vld [vmem:[#allocation5 + $0x268] sm:$0xff] }
 0x2d8   :  { %v837_v25 = vld [vmem:[#allocation5 + $0x148] sm:$0xff] }
 0x2d9   :  { %v1938_v33 = vmax.f32 %v642_v30, 0.0  ;;  %1180 = vmatpush.msra.mxu3 %v837_v25 }
 0x2db   :  { %1010 = vmatmul.f32.vlgmr.msrb.gmra.mxu2 %v1938_v33  ;;  %v592_v50 = vpop.f32.mrf.mxu1  ;;  %v756_v57 = vrot.slane %v1938_v33, 1  ;;  %v776_v35 = vrot.slane %v1938_v33, 2  ;;  %1181 = vmatpush.msra.mxu3 %v835_v32  ;;  %v909_v32 = vld [vmem:[#allocation5 + $0x388] sm:$0xff] }
 0x2dc   :  { %v615_v40 = vpop.f32.mrf.mxu3  ;;  %v644_v41 = vpop.f32.mrf.mxu2  ;;  %1194 = vmatpush.msrb.mxu2 %v891_v34  ;;  %v593_v20 = vadd.f32 %v592_v50, %v1935_v12  ;;  %v871_v12 = vld [vmem:[#allocation5 + $0x258] sm:$0xff] }
 0x2dd   :  { %v616_v43 = vadd.f32 %v615_v40, %v587_v37  ;;  %v671_v37 = vadd.f32 %v670_v11, %v1958_v26  ;;  %v833_v40 = vld [vmem:[#allocation5 + $0x128] sm:$0xff]  ;;  %v831_v50 = vld [vmem:[#allocation5 + $0x118] sm:$0xff] }
 0x2de   :  { %1195 = vmatpush.msrb.mxu2 %v889_v38  ;;  %1182 = vmatpush.msra.mxu3 %v833_v40 }
 0x2df   :  { %v645_v47 = vadd.f32 %v644_v41, %v616_v43  ;;  %v673_v41 = vpop.f32.mrf.mxu0  ;;  %v941_v43 = vld [vmem:[#allocation5 + $0x488] sm:$0xff] }
 0x2e0   :  { %1196 = vmatpush.msrb.mxu2 %v887_v44  ;;  %1183 = vmatpush.msra.mxu3 %v831_v50 }
 0x2e1   :  { %v1942_v52 = vmax.f32 %v645_v47, 0.0 }
 0x2e2   :  { %1197 = vmatpush.msrb.mxu2 %v885_v48 }
 0x2e3   :  { %1013 = vmatmul.f32.gmra.mxu2 %v1942_v52  ;;  %v757_v58 = vrot.slane %v1942_v52, 1  ;;  %v699_v17 = vpop.f32.mrf.mxu1  ;;  %v777_v30 = vrot.slane %v1942_v52, 2 }
 0x2e4   :  { %v618_v61 = vpop.f32.mrf.mxu3  ;;  %v647_v62 = vpop.f32.mrf.mxu2  ;;  %1198 = vmatpush.msrb.mxu2 %v883_v53  ;;  %v700_v44 = vadd.f32 %v699_v17, %v671_v37  ;;  %v915_v17 = vld [vmem:[#allocation5 + $0x3b8] sm:$0xff] }
 0x2e5   :  { %v619_v1 = vadd.f32 %v618_v61, %v590_v56  ;;  %v1949_v2 = vsel %vm138_vm2, %v756_v57, %v757_v58  ;;  %v1971_v42 = vsel %vm158_vm0, %v776_v35, %v777_v30  ;;  %v937_v56 = vld [vmem:[#allocation5 + $0x468] sm:$0xff]  ;;  %v674_v61 = vadd.f32 %v673_v41, %v1958_v26 }
 0x2e6   :  { %1060 = vmatmul.f32.vlgmr.msrb.gmra.mxu1 %v1949_v2  ;;  %1199 = vmatpush.msrb.mxu2 %v881_v59  ;;  %v923_v59 = vld [vmem:[#allocation5 + $0x3f8] sm:$0xff]  ;;  %v905_v41 = vld [vmem:[#allocation5 + $0x368] sm:$0xff] }
 0x2e7   :  { %v648_v8 = vadd.f32 %v647_v62, %v619_v1  ;;  %1244 = vmatpush.msrb.mxu1 %v955_v63  ;;  %v921_v62 = vld [vmem:[#allocation5 + $0x3e8] sm:$0xff] }
 0x2e8   :  { %1200 = vmatpush.msrb.mxu2 %v879_v3  ;;  %v829_v63 = vld [vmem:[#allocation5 + $0x108] sm:$0xff] }
 0x2e9   :  { %v1952_v14 = vmax.f32 %v648_v8, 0.0  ;;  %1245 = vmatpush.msrb.mxu1 %v953_v6  ;;  %v933_v1 = vld [vmem:[#allocation5 + $0x448] sm:$0xff]  ;;  %v676_v6 = vpop.f32.mrf.mxu0  ;;  %v931_v8 = vld [vmem:[#allocation5 + $0x438] sm:$0xff]  ;;  %1184 = vmatpush.msra.mxu3 %v829_v63 }
 0x2ea   :  { %1201 = vmatpush.msrb.mxu2 %v877_v9  ;;  %v677_v19 = vadd.f32 %v676_v6, %v1958_v26  ;;  %v969_v63 = vld [vmem:[#allocation5 + $0x568] sm:$0xff]  ;;  %v963_v6 = vld [vmem:[#allocation5 + $0x538] sm:$0xff] }
 0x2eb   :  { %1015 = vmatmul.f32.gmra.mxu2 %v1952_v14  ;;  %v762_v21 = vrot.slane %v1952_v14, 1  ;;  %1246 = vmatpush.msrb.mxu1 %v951_v13  ;;  %v702_v47 = vpop.f32.mrf.mxu1  ;;  %v782_v55 = vrot.slane %v1952_v14, 2 }
 0x2ec   :  { %v621_v23 = vpop.f32.mrf.mxu3  ;;  %1202 = vmatpush.msrb.mxu2 %v875_v15  ;;  %v650_v29 = vpop.f32.mrf.mxu2  ;;  %v703_v3 = vadd.f32 %v702_v47, %v674_v61  ;;  %v929_v15 = vld [vmem:[#allocation5 + $0x428] sm:$0xff]  ;;  %v895_v61 = vld [vmem:[#allocation5 + $0x318] sm:$0xff] }
 0x2ed   :  { %v622_v27 = vadd.f32 %v621_v23, %v593_v20  ;;  %v1961_v28 = vsel %vm138_vm2, %v757_v58, %v762_v21  ;;  %1247 = vmatpush.msrb.mxu1 %v949_v18  ;;  %v861_v58 = vld [vmem:[#allocation5 + $0x208] sm:$0xff]  ;;  %v1984_v0 = vsel %vm158_vm0, %v777_v30, %v782_v55  ;;  %v927_v18 = vld [vmem:[#allocation5 + $0x418] sm:$0xff] }
 0x2ee   :  { %1063 = vmatmul.f32.gmra.mxu1 %v1961_v28  ;;  %1203 = vmatpush.msrb.mxu2 %v873_v22  ;;  %v913_v22 = vld [vmem:[#allocation5 + $0x3a8] sm:$0xff] }
 0x2ef   :  { %v1965_v34 = vadd.f32 %v650_v29, %v622_v27  ;;  %1248 = vmatpush.msrb.mxu1 %v947_v24  ;;  %v925_v23 = vld [vmem:[#allocation5 + $0x408] sm:$0xff]  ;;  %v987_v24 = vld [vmem:[#allocation5 + $0x5f8] sm:$0xff] }
 0x2f0   :  { %1204 = vmatpush.msrb.mxu2 %v871_v12  ;;  %v911_v12 = vld [vmem:[#allocation5 + $0x398] sm:$0xff]  ;;  %v985_v30 = vld [vmem:[#allocation5 + $0x5e8] sm:$0xff] }
 0x2f1   :  { %v746_v38 = vmax.f32 %v1965_v34, 0.0  ;;  %1249 = vmatpush.msrb.mxu1 %v945_v31  ;;  %v679_v34 = vpop.f32.mrf.mxu0  ;;  %v977_v47 = vld [vmem:[#allocation5 + $0x5a8] sm:$0xff] }
 0x2f2   :  { %1205 = vmatpush.msrb.mxu2 %v869_v5  ;;  %v983_v5 = vld [vmem:[#allocation5 + $0x5d8] sm:$0xff] }
 0x2f3   :  { %v766_v45 = vrot.slane %v746_v38, 1  ;;  %1110 = vmatmul.f32.vlgmr.msra.gmra.mxu2 %v1971_v42  ;;  %1250 = vmatpush.msrb.mxu1 %v943_v36  ;;  %v786_v11 = vrot.slane %v746_v38, 2  ;;  %v705_v13 = vpop.f32.mrf.mxu1  ;;  %v907_v36 = vld [vmem:[#allocation5 + $0x378] sm:$0xff]  ;;  %v981_v38 = vld [vmem:[#allocation5 + $0x5c8] sm:$0xff] }
 0x2f4   :  { %v728_v48 = vpop.f32.mrf.mxu3  ;;  %1206 = vmatpush.msrb.mxu2 %v867_v39  ;;  %v706_v25 = vadd.f32 %v705_v13, %v677_v19  ;;  %v680_v39 = vadd.f32 %v679_v34, %v1958_v26  ;;  %v988_v13 = vld [vmem:[%s2071_s10] sm:$0x3] }
 0x2f5   :  { %v729_v51 = vadd.f32 %v728_v48, %v700_v44  ;;  %v1975_v53 = vsel %vm138_vm2, %v762_v21, %v766_v45  ;;  %1251 = vmatpush.msrb.mxu1 %v941_v43  ;;  %v979_v43 = vld [vmem:[#allocation5 + $0x5b8] sm:$0xff] }
 0x2f6   :  { %1065 = vmatmul.f32.gmra.mxu1 %v1975_v53  ;;  %1207 = vmatpush.msrb.mxu2 %v865_v46  ;;  %v903_v45 = vld [vmem:[#allocation5 + $0x358] sm:$0xff] }
 0x2f7   :  { %v1979_v57 = vmax.f32 %v729_v51, 0.0  ;;  %1252 = vmatpush.msrb.mxu1 %v939_v49  ;;  %v901_v49 = vld [vmem:[#allocation5 + $0x348] sm:$0xff] }
 0x2f8   :  { %1208 = vmatpush.msrb.mxu2 %v863_v54  ;;  %v899_v54 = vld [vmem:[#allocation5 + $0x338] sm:$0xff] }
 0x2f9   :  { %1035 = vmatmul.f32.vlgmr.msrb.gmra.mxu0 %v1979_v57  ;;  %1253 = vmatpush.msrb.mxu1 %v937_v56  ;;  %v759_v20 = vrot.slane %v1979_v57, 1  ;;  %v779_v50 = vrot.slane %v1979_v57, 2  ;;  %v973_v56 = vld [vmem:[#allocation5 + $0x588] sm:$0xff] }
 0x2fa   :  { %1209 = vmatpush.msrb.mxu2 %v861_v58  ;;  %1219 = vmatpush.msrb.mxu0 %v923_v59  ;;  %v897_v59 = vld [vmem:[#allocation5 + $0x328] sm:$0xff] }
 0x2fb   :  { %1113 = vmatmul.f32.gmra.mxu2 %v1984_v0  ;;  %1254 = vmatpush.msrb.mxu1 %v935_v60  ;;  %v708_v37 = vpop.f32.mrf.mxu1  ;;  %v971_v60 = vld [vmem:[#allocation5 + $0x578] sm:$0xff] }
 0x2fc   :  { %v731_v7 = vpop.f32.mrf.mxu3  ;;  %1220 = vmatpush.msrb.mxu0 %v921_v62 }
 0x2fd   :  { %v732_v9 = vadd.f32 %v731_v7, %v703_v3  ;;  %1255 = vmatpush.msrb.mxu1 %v933_v1  ;;  %v893_v1 = vld [vmem:[#allocation5 + $0x308] sm:$0xff]  ;;  %v967_v3 = vld [vmem:[#allocation5 + $0x558] sm:$0xff] }
 0x2fe   :  { %1160 = vmatmul.f32.vlgmr.msra.gmra.mxu1 %v1938_v33  ;;  %1221 = vmatpush.msrb.mxu0 %v919_v4  ;;  %v1995_v33 = vsel %vm158_vm0, %v782_v55, %v786_v11 }
 0x2ff   :  { %v1988_v16 = vmax.f32 %v732_v9, 0.0  ;;  %1256 = vmatpush.msrb.mxu1 %v931_v8  ;;  %v961_v8 = vld [vmem:[#allocation5 + $0x528] sm:$0xff] }
 0x300   :  { %1222 = vmatpush.msrb.mxu0 %v917_v10  ;;  %v957_v10 = vld [vmem:[#allocation5 + $0x508] sm:$0xff] }
 0x301   :  { %1038 = vmatmul.f32.gmra.mxu0 %v1988_v16  ;;  %v760_v21 = vrot.slane %v1988_v16, 1  ;;  %1257 = vmatpush.msrb.mxu1 %v929_v15  ;;  %v780_v26 = vrot.slane %v1988_v16, 2 }
 0x302   :  { %1223 = vmatpush.msrb.mxu0 %v915_v17 }
 0x303   :  { %1115 = vmatmul.f32.gmra.mxu2 %v1995_v33  ;;  %v1999_v27 = vsel %vm138_vm2, %v759_v20, %v760_v21  ;;  %1258 = vmatpush.msrb.mxu1 %v927_v18  ;;  %v781_v55 = vsel %vm158_vm0, %v779_v50, %v780_v26 }
 0x304   :  { %v734_v29 = vpop.f32.mrf.mxu3  ;;  %1085 = vmatmul.f32.vlgmr.msrb.gmra.mxu3 %v1999_v27  ;;  %1224 = vmatpush.msrb.mxu0 %v913_v22 }
 0x305   :  { %v735_v31 = vadd.f32 %v734_v29, %v706_v25  ;;  %1259 = vmatpush.msrb.mxu1 %v925_v23  ;;  %1269 = vmatpush.msrb.mxu3 %v987_v24 }
 0x306   :  { %1163 = vmatmul.f32.gmra.mxu1 %v1942_v52  ;;  %1225 = vmatpush.msrb.mxu0 %v911_v12  ;;  %v709_v52 = vadd.f32 %v708_v37, %v680_v39 }
 0x307   :  { %v2003_v35 = vmax.f32 %v735_v31, 0.0  ;;  %1270 = vmatpush.msrb.mxu3 %v985_v30 }
 0x308   :  { %1226 = vmatpush.msrb.mxu0 %v909_v32 }
 0x309   :  { %1040 = vmatmul.f32.gmra.mxu0 %v2003_v35  ;;  %v764_v40 = vrot.slane %v2003_v35, 1  ;;  %1271 = vmatpush.msrb.mxu3 %v983_v5  ;;  %v784_v62 = vrot.slane %v2003_v35, 2 }
 0x30a   :  { %1227 = vmatpush.msrb.mxu0 %v907_v36 }
 0x30b   :  { %1210 = vmatmul.f32.vlgmr.msrb.gmra.mxu2 %v1949_v2  ;;  %v2010_v44 = vsel %vm138_vm2, %v760_v21, %v764_v40  ;;  %1272 = vmatpush.msrb.mxu3 %v981_v38  ;;  %v975_v2 = vld [vmem:[#allocation5 + $0x598] sm:$0xff]  ;;  %v785_v4 = vsel %vm158_vm0, %v780_v26, %v784_v62 }
 0x30c   :  { %v737_v46 = vpop.f32.mrf.mxu3  ;;  %1088 = vmatmul.f32.gmra.mxu3 %v2010_v44  ;;  %1228 = vmatpush.msrb.mxu0 %v905_v41 }
 0x30d   :  { %v738_v48 = vadd.f32 %v737_v46, %v709_v52  ;;  %1273 = vmatpush.msrb.mxu3 %v979_v43 }
 0x30e   :  { %1165 = vmatmul.f32.gmra.mxu1 %v1952_v14  ;;  %1229 = vmatpush.msrb.mxu0 %v903_v45 }
 0x30f   :  { %v747_v51 = vmax.f32 %v738_v48, 0.0  ;;  %1274 = vmatpush.msrb.mxu3 %v977_v47 }
 0x310   :  { %1230 = vmatpush.msrb.mxu0 %v901_v49 }
 0x311   :  { %v768_v58 = vrot.slane %v747_v51, 1  ;;  %1135 = vmatmul.f32.vlgmr.msra.gmra.mxu0 %v781_v55  ;;  %1275 = vmatpush.msrb.mxu3 %v975_v2  ;;  %v788_v7 = vrot.slane %v747_v51, 2 }
 0x312   :  { %1231 = vmatpush.msrb.mxu0 %v899_v54 }
 0x313   :  { %1213 = vmatmul.f32.gmra.mxu2 %v1961_v28  ;;  %v769_v14 = vsel %vm138_vm2, %v764_v40, %v768_v58  ;;  %1276 = vmatpush.msrb.mxu3 %v973_v56  ;;  %v965_v28 = vld [vmem:[#allocation5 + $0x548] sm:$0xff]  ;;  %v789_v9 = vsel %vm158_vm0, %v784_v62, %v788_v7 }
 0x314   :  { %1090 = vmatmul.f32.gmra.mxu3 %v769_v14  ;;  %1232 = vmatpush.msrb.mxu0 %v897_v59 }
 0x315   :  { %1277 = vmatpush.msrb.mxu3 %v971_v60 }
 0x316   :  { %1260 = vmatmul.f32.vlgmr.msrb.gmra.mxu1 %v1971_v42  ;;  %1233 = vmatpush.msrb.mxu0 %v895_v61  ;;  %v959_v42 = vld [vmem:[#allocation5 + $0x518] sm:$0xff]  ;;  %v1299_v61 = vld [vmem:[%s2072_s11 + $0x8] sm:$0xff] }
 0x317   :  { %1278 = vmatpush.msrb.mxu3 %v969_v63 }
 0x318   :  { %1234 = vmatpush.msrb.mxu0 %v893_v1 }
 0x319   :  { %1138 = vmatmul.f32.gmra.mxu0 %v785_v4  ;;  %1279 = vmatpush.msrb.mxu3 %v967_v3 }
 0x31b   :  { %1215 = vmatmul.f32.gmra.mxu2 %v1975_v53  ;;  %1280 = vmatpush.msrb.mxu3 %v965_v28 }
 0x31c   :  { %1185 = vmatmul.f32.vlgmr.msra.gmra.mxu3 %v1979_v57 }
 0x31d   :  { %1281 = vmatpush.msrb.mxu3 %v963_v6 }
 0x31e   :  { %1263 = vmatmul.f32.gmra.mxu1 %v1984_v0 }
 0x31f   :  { %1282 = vmatpush.msrb.mxu3 %v961_v8 }
 0x321   :  { %1140 = vmatmul.f32.gmra.mxu0 %v789_v9  ;;  %1283 = vmatpush.msrb.mxu3 %v959_v42 }
 0x323   :  { %1284 = vmatpush.msrb.mxu3 %v957_v10 }
 0x324   :  { %1188 = vmatmul.f32.gmra.mxu3 %v1988_v16  ;;  %v990_v16 = vperm.slane %v988_v13, 0 }
 0x326   :  { %1265 = vmatmul.f32.gmra.mxu1 %v1995_v33 }
 0x329   :  { %1235 = vmatmul.f32.vlgmr.msrb.gmra.mxu0 %v1999_v27 }
 0x32c   :  { %1190 = vmatmul.f32.gmra.mxu3 %v2003_v35 }
 0x331   :  { %1238 = vmatmul.f32.gmra.mxu0 %v2010_v44  ;;  %v991_v44 = vperm.slane %v988_v13, 1 }
 0x334   :  { %1285 = vmatmul.f32.vlgmr.msrb.gmra.mxu3 %v781_v55 }
 0x339   :  { %1240 = vmatmul.f32.gmra.mxu0 %v769_v14  ;;  %v1298_v14 = vld [vmem:[%s2072_s11] sm:$0xff] }
 0x33c   :  { %1288 = vmatmul.f32.gmra.mxu3 %v785_v4 }
 0x344   :  { %1290 = vmatmul.f32.gmra.mxu3 %v789_v9  ;;  %v1301_v9 = vld [vmem:[%s2072_s11 + $0x18] sm:$0xff] }
 0x35e   :  { %v1011_v53 = vpop.f32.mrf.mxu2 }
 0x35f   :  { %v1012_v18 = vadd.f32 %v1011_v53, %v990_v16  ;;  %v1300_v53 = vld [vmem:[%s2072_s11 + $0x10] sm:$0xff] }
 0x363   :  { %v1061_v57 = vpop.f32.mrf.mxu1 }
 0x366   :  { %v1014_v0 = vpop.f32.mrf.mxu2 }
 0x36b   :  { %v1064_v11 = vpop.f32.mrf.mxu1 }
 0x36e   :  { %v1016_v15 = vpop.f32.mrf.mxu2 }
 0x36f   :  { %v1017_v27 = vadd.f32 %v1016_v15, %v990_v16 }
 0x373   :  { %v1066_v17 = vpop.f32.mrf.mxu1 }
 0x376   :  { %v1036_v19 = vpop.f32.mrf.mxu0  ;;  %v1111_v20 = vpop.f32.mrf.mxu2 }
 0x377   :  { %v1037_v21 = vadd.f32 %v1036_v19, %v1012_v18 }
 0x379   :  { %v1062_v22 = vadd.f32 %v1061_v57, %v1037_v21 }
 0x37b   :  { %v1161_v33 = vpop.f32.mrf.mxu1 }
 0x37c   :  { %v1162_v26 = vadd.f32 %v1161_v33, %v991_v44 }
 0x37e   :  { %v1039_v23 = vpop.f32.mrf.mxu0  ;;  %v1114_v24 = vpop.f32.mrf.mxu2 }
 0x37f   :  { %v1302_v23 = vld [vmem:[%s2072_s11 + $0x20] sm:$0xff] }
 0x383   :  { %v1164_v25 = vpop.f32.mrf.mxu1 }
 0x386   :  { %v1041_v12 = vpop.f32.mrf.mxu0  ;;  %v1116_v29 = vpop.f32.mrf.mxu2 }
 0x387   :  { %v1042_v30 = vadd.f32 %v1041_v12, %v1017_v27  ;;  %v1086_v31 = vpop.f32.mrf.mxu3 }
 0x388   :  { %v1087_v48 = vadd.f32 %v1086_v31, %v1062_v22  ;;  %v1303_v22 = vld [vmem:[%s2072_s11 + $0x28] sm:$0xff] }
 0x389   :  { %v1067_v32 = vadd.f32 %v1066_v17, %v1042_v30 }
 0x38a   :  { %v1112_v51 = vadd.f32 %v1111_v20, %v1087_v48 }
 0x38b   :  { %v1166_v34 = vpop.f32.mrf.mxu1 }
 0x38c   :  { %v1167_v62 = vadd.f32 %v1166_v34, %v991_v44 }
 0x38e   :  { %v1136_v5 = vpop.f32.mrf.mxu0  ;;  %v1211_v35 = vpop.f32.mrf.mxu2 }
 0x38f   :  { %v1089_v36 = vpop.f32.mrf.mxu3  ;;  %v1137_v55 = vadd.f32 %v1136_v5, %v1112_v51 }
 0x391   :  { %v1294_v59 = vmax.f32 %v1137_v55, 0.0 }
 0x393   :  { %v1261_v37 = vpop.f32.mrf.mxu1  ;;  %v1304_v3 = vmul.f32 %v1298_v14, %v1294_v59  ;;  %v1306_v15 = vmul.f32 %v1300_v53, %v1294_v59  ;;  %v1308_v30 = vmul.f32 %v1302_v23, %v1294_v59  ;;  %v1426_v59 = vld [vmem:[%s2073_s12] ss:$0 sm:$0xff] }
 0x396   :  { %v1139_v38 = vpop.f32.mrf.mxu0  ;;  %v1214_v39 = vpop.f32.mrf.mxu2 }
 0x397   :  { %v1091_v40 = vpop.f32.mrf.mxu3 }
 0x398   :  { %v1092_v28 = vadd.f32 %v1091_v40, %v1067_v32 }
 0x39a   :  { %v1117_v57 = vadd.f32 %v1116_v29, %v1092_v28 }
 0x39b   :  { %v1264_v41 = vpop.f32.mrf.mxu1 }
 0x39e   :  { %v1141_v43 = vpop.f32.mrf.mxu0  ;;  %v1216_v6 = vpop.f32.mrf.mxu2 }
 0x39f   :  { %v1186_v52 = vpop.f32.mrf.mxu3  ;;  %v1142_v13 = vadd.f32 %v1141_v43, %v1117_v57 }
 0x3a0   :  { %v1187_v47 = vadd.f32 %v1186_v52, %v1162_v26 }
 0x3a1   :  { %v1296_v20 = vmax.f32 %v1142_v13, 0.0 }
 0x3a2   :  { %v1212_v2 = vadd.f32 %v1211_v35, %v1187_v47 }
 0x3a3   :  { %v1266_v16 = vpop.f32.mrf.mxu1  ;;  %v1312_v25 = vmul.f32 %v1300_v53, %v1296_v20  ;;  %v1310_v12 = vmul.f32 %v1298_v14, %v1296_v20  ;;  %v1314_v35 = vmul.f32 %v1302_v23, %v1296_v20 }
 0x3a6   :  { %v1236_v45 = vpop.f32.mrf.mxu0 }
 0x3a7   :  { %v1189_v46 = vpop.f32.mrf.mxu3  ;;  %v1237_v54 = vadd.f32 %v1236_v45, %v1212_v2 }
 0x3a9   :  { %v1262_v56 = vadd.f32 %v1261_v37, %v1237_v54  ;;  %v1340_v37 = vlaneseq }
 0x3ab   :  { %v1367_v38 = vshrl.u32 %v1340_v37, 7  ;;  %v1341_v41 = vand.u32 127, %v1340_v37 }
 0x3ad   :  { %1420 = vset.pattern.permute.xlu2 %v1367_v38 }
 0x3ae   :  { %v1239_v49 = vpop.f32.mrf.mxu0 }
 0x3af   :  { %v1191_v50 = vpop.f32.mrf.mxu3 }
 0x3b0   :  { %v1192_v1 = vadd.f32 %v1191_v50, %v1167_v62 }
 0x3b2   :  { %v1217_v10 = vadd.f32 %v1216_v6, %v1192_v1 }
 0x3b6   :  { %v1241_v8 = vpop.f32.mrf.mxu0 }
 0x3b7   :  { %v1286_v58 = vpop.f32.mrf.mxu3  ;;  %v1242_v0 = vadd.f32 %v1241_v8, %v1217_v10 }
 0x3b8   :  { %v1287_v60 = vadd.f32 %v1286_v58, %v1262_v56 }
 0x3b9   :  { %v1267_v17 = vadd.f32 %v1266_v16, %v1242_v0 }
 0x3ba   :  { %v1295_v63 = vmax.f32 %v1287_v60, 0.0  ;;  %v1510_v60 = vmov 0  }
 0x3bb   :  { %1422 = vset.pattern.permute.xlu1 %v1510_v60  ;;  %1421 = vset.pattern.permute.xlu0 %v1510_v60 }
 0x3bc   :  { %v1305_v4 = vmul.f32 %v1299_v61, %v1295_v63  ;;  %v1307_v11 = vmul.f32 %v1301_v9, %v1295_v63  ;;  %v1309_v24 = vmul.f32 %v1303_v22, %v1295_v63 }
 0x3be   :  { %v1316_v7 = vadd.f32 %v1305_v4, %v1304_v3  ;;  %v1319_v18 = vadd.f32 %v1307_v11, %v1306_v15  ;;  %v1322_v34 = vadd.f32 %v1309_v24, %v1308_v30 }
 0x3bf   :  { %v1289_v42 = vpop.f32.mrf.mxu3 }
 0x3c0   :  { %1317 = vadd.xlane.f32.xlu2 %v1316_v7 }
 0x3c7   :  { %v1291_v19 = vpop.f32.mrf.mxu3 }
 0x3c8   :  { %v1292_v21 = vadd.f32 %v1291_v19, %v1267_v17  ;;  %1320 = vadd.xlane.f32.xlu2 %v1319_v18 }
 0x3ca   :  { %v1297_v33 = vmax.f32 %v1292_v21, 0.0 }
 0x3cc   :  { %v1313_v27 = vmul.f32 %v1301_v9, %v1297_v33  ;;  %v1311_v29 = vmul.f32 %v1299_v61, %v1297_v33  ;;  %v1315_v5 = vmul.f32 %v1303_v22, %v1297_v33 }
 0x3ce   :  { %v1328_v31 = vadd.f32 %v1313_v27, %v1312_v25  ;;  %v1325_v32 = vadd.f32 %v1311_v29, %v1310_v12  ;;  %v1331_v36 = vadd.f32 %v1315_v5, %v1314_v35 }
 0x3d0   :  { %1329 = vadd.xlane.f32.xlu1 %v1328_v31  ;;  %1326 = vadd.xlane.f32.xlu0 %v1325_v32 }
 0x3d1   :  { %1323 = vadd.xlane.f32.xlu2 %v1322_v34 }
 0x3d9   :  { %1332 = vadd.xlane.f32.xlu2 %v1331_v36 }
 0x433   :  { %v1318_v39 = vpop.xlane.xlu2 %1317 }
 0x434   :  { %v1342_v52 = vperm.slane %v1318_v39, %v1341_v41 }
 0x43b   :  { %v1321_v40 = vpop.xlane.xlu2 %1320 }
 0x43c   :  { %v1343_v43 = vperm.slane %v1321_v40, %v1341_v41 }
 0x43e   :  { %v1349_v46 = vsel %vm1348_vm3, %v1343_v43, %v1342_v52 }
 0x443   :  { %v1330_v26 = vpop.xlane.xlu1 %1329  ;;  %v1327_v47 = vpop.xlane.xlu0 %1326 }
 0x444   :  { %v1324_v44 = vpop.xlane.xlu2 %1323  ;;  %v1346_v50 = vperm.slane %v1330_v26, %v1341_v41  ;;  %v1345_v2 = vperm.slane %v1327_v47, %v1341_v41 }
 0x445   :  { %v1344_v45 = vperm.slane %v1324_v44, %v1341_v41 }
 0x446   :  { %v1352_v55 = vsel %vm1348_vm3, %v1346_v50, %v1345_v2 }
 0x447   :  { %v1351_v48 = vsel %vm1350_vm4, %v1344_v45, %v1349_v46 }
 0x448   :  { %v1357_v49 = vsel %vm1356_vm5, %v1351_v48, 0.0 }
 0x449   :  { %1358 = vadd.xlane.f32.xlu2 %v1357_v49 }
 0x44c   :  { %v1333_v51 = vpop.xlane.xlu2 %1332 }
 0x44d   :  { %v1347_v54 = vperm.slane %v1333_v51, %v1341_v41 }
 0x44f   :  { %v1353_v56 = vsel %vm1350_vm4, %v1347_v54, %v1352_v55 }
 0x450   :  { %v1360_v58 = vsel %vm1356_vm5, %v1353_v56, 0.0 }
 0x451   :  { %1361 = vadd.xlane.f32.xlu2 %v1360_v58 }
 0x469   :  { %1370 = vperm.xlu2 %1420, %v1426_v59  }
 0x4bc   :  { %v1359_v14 = vpop.xlane.xlu2 %1358 }
 0x4c4   :  { %v1362_v61 = vpop.xlane.xlu2 %1361 }
 0x4cc   :  { %v1371_v62 = vpop.permute.xlu2 %1370 }
 0x4cd   :  { %v1373_v63 = vadd.f32 %v1371_v62, %v1359_v14  ;;  %v1374_v1 = vadd.f32 %v1371_v62, %v1362_v61 }
 0x4cf   :  { %v1375_v3 = vmax.f32 %v1373_v63, 0.0  ;;  %v1376_v4 = vmax.f32 %v1374_v1, 0.0 }
 0x4d1   :  { %1383 = vperm.xlu1 %1422, %v1376_v4   ;;  %1380 = vperm.xlu0 %1421, %v1375_v3  }
 0x543   :  { %v1384_v28 = vpop.permute.xlu1 %1383  ;;  %v1381_v6 = vpop.permute.xlu0 %1380 }
 0x544   :  { %v1386_v7 = vperm.slane %v1384_v28, %v1341_v41  ;;  %v1385_v8 = vperm.slane %v1381_v6, %v1341_v41 }
 0x546   :  { %v1387_v42 = vsel %vm1348_vm3, %v1386_v7, %v1385_v8 }
 0x547   :  { %1390 = vst.msk [vmem:[#allocation7] sm:$0x3] %vm1389_vm6, %v1387_v42 }
 0x548   :  { %1401 = dma.vmem_to_hbm [thread:$0]  %s1397_s24, 32, %s1399_s27, [#allocation4]  }
 0x549   :  { %1503 = dma.done.wait [#allocation4], 32  }
 0x54a   :  { %1504 = vsyncadd [#allocation4], 4294967264 }
 0x54b   :  { %1406 = vsyncpa [#allocation3], 1 }
 0x54c   :  { %1407 = vsyncpa [#allocation6], 1 }
 0x54d   :  { %1408 = vsyncpa [#allocation4], 1 }

</bundles_post_ra>
